<compile_context>
chip_gen: v7x
topology: tpu7x:2x2x1
jax: 0.10.0
libtpu: 0.0.40
codegen_flags: <defaults>
</compile_context>

<pallas_src>
import functools

import jax
import jax.numpy as jnp
from jax.experimental import pallas as pl
from jax.experimental.pallas import tpu as pltpu

LANE = 128       # lane width (last dim) -> feature-channel padding
MXU_ALIGN = 256  # row / contraction (K) padding: full-width v6e/v7x MXU passes
                 # (also a multiple of 128, so lane-dense on v5e)

_VMEM_SPEC = pl.BlockSpec(memory_space=pltpu.MemorySpace.VMEM)


def _round_up(v, m):
    return (v + m - 1) // m * m


def _pick_vmem_limit_bytes():
    """Generation-aware scoped-VMEM limit (leave headroom on 64 MiB parts)."""
    default = 32 * 1024 * 1024
    try:
        info = pltpu.get_tpu_info()
        cap = getattr(info, "vmem_capacity_bytes", None)
        if not cap:
            return default
        if cap >= 128 * 1024 * 1024:           # v5e / v6e: 128 MiB physical
            return 64 * 1024 * 1024
        # v7x-class (64 MiB physical): cap at ~48 MiB for compiler scratch room
        return max(default, min(48 * 1024 * 1024, cap - 16 * 1024 * 1024))
    except Exception:
        return default


_VMEM_LIMIT_BYTES = _pick_vmem_limit_bytes()


# ---------------------------------------------------------------------------
# Fused Pallas kernel: all SAGE layers + log_softmax in one pass
# ---------------------------------------------------------------------------
def _sage_forward_kernel(a_ref, x_ref, *refs, meta):
    """refs = (wl_0, wr_0, b_0, ..., wl_{L-1}, wr_{L-1}, b_{L-1}, o_ref).

    meta[i] = (c_in_padded, c_out_padded, aggregate_first) -- static Python data.
    """
    o_ref = refs[-1]
    num_layers = len(meta)

    a = a_ref[...]              # bf16 [Np, Np], loaded once, stays in VMEM
    x = x_ref[...]              # bf16 [Np, C0p]

    for li in range(num_layers):
        wl_ref = refs[3 * li]          # bf16 [Cin_p, Cout_p]
        wr_ref = refs[3 * li + 1]      # bf16 [Cin_p, Cout_p]
        b_ref = refs[3 * li + 2]       # f32  [1, Cout_p] (BN shift folded in)
        aggregate_first = meta[li][2]

        if aggregate_first:
            # C_in <= C_out: agg = A @ x on the narrow C_in, then two MXU
            # projections accumulated in f32 (no concat, no VMEM temp).
            agg = jnp.dot(a, x, preferred_element_type=jnp.float32)
            out = (
                jnp.dot(agg.astype(jnp.bfloat16), wl_ref[...],
                        preferred_element_type=jnp.float32)
                + jnp.dot(x, wr_ref[...], preferred_element_type=jnp.float32)
            )
        else:
            # C_out < C_in: project first (cheaper N^2 contraction on C_out).
            p_l = jnp.dot(x, wl_ref[...], preferred_element_type=jnp.float32)
            p_r = jnp.dot(x, wr_ref[...], preferred_element_type=jnp.float32)
            out = (
                jnp.dot(a, p_l.astype(jnp.bfloat16),
                        preferred_element_type=jnp.float32)
                + p_r
            )

        out = out + b_ref[...]        # bias (+ folded BN shift), f32

        if li < num_layers - 1:
            # BN scale already folded into W/b; ReLU; dropout == identity (eval)
            out = jnp.maximum(out, 0.0)
            x = out.astype(jnp.bfloat16)
        else:
            # Fused numerically-stable log_softmax.  Pad logit columns hold a
            # -1e30 bias (f32), so exp() underflows to 0 and doesn't perturb lse.
            m = jnp.max(out, axis=-1, keepdims=True)
            s = out - m
            lse = jnp.log(jnp.sum(jnp.exp(s), axis=-1, keepdims=True))
            o_ref[...] = s - lse


# ---------------------------------------------------------------------------
# Host-side parameter folding / packing (done once)
# ---------------------------------------------------------------------------
def fold_and_pack_params(params):
    """Fold eval-mode BN into Wl/Wr/b and zero-pad feature dims to 128 lanes."""
    packed = []
    meta = []
    num_layers = len(params)
    for li, p in enumerate(params):
        wl, wr, b = p["wl"], p["wr"], p["b"]
        c_in, c_out = wl.shape
        last = li == num_layers - 1

        if not last:
            # BN(eval): y = conv(x) * scale + shift  ->  fold into W and b
            scale, shift = p["scale"], p["shift"]
            wl = wl * scale
            wr = wr * scale
            b = b * scale + shift

        c_in_p = _round_up(c_in, LANE)
        c_out_p = _round_up(c_out, LANE)
        wl_p = jnp.pad(wl, ((0, c_in_p - c_in), (0, c_out_p - c_out)))
        wr_p = jnp.pad(wr, ((0, c_in_p - c_in), (0, c_out_p - c_out)))
        # Last layer: pad logit columns get -1e30 so fused log_softmax ignores
        # them (kept in f32 -- do not narrow this bias).
        pad_val = -1e30 if last else 0.0
        b_p = jnp.pad(b, ((0, 0), (0, c_out_p - c_out)), constant_values=pad_val)

        packed.append((wl_p.astype(jnp.bfloat16),
                       wr_p.astype(jnp.bfloat16),
                       b_p.astype(jnp.float32)))
        meta.append((c_in_p, c_out_p, bool(c_in <= c_out)))
    return packed, tuple(meta)


# ---------------------------------------------------------------------------
# Forward wrapper: pad inputs, one pallas_call, slice output
# ---------------------------------------------------------------------------
@functools.partial(jax.jit, static_argnames=("meta", "out_channels"))
def sage_forward(a, x, packed_params, *, meta, out_channels):
    n, c0 = x.shape
    # Pad N (rows of x/out AND the lane / MXU-K dim of A) to a 256 multiple:
    # lane-dense A vregs and full-width systolic passes on v5e/v6e/v7x.
    n_p = _round_up(n, MXU_ALIGN)
    c0_p = meta[0][0]
    c_last_p = meta[-1][1]

    # TODO(synk): A and activations use bf16 MXU inputs; for very deep nets or
    # high-degree graphs keep A in f32 (3-pass matmul) if accuracy matters.
    a_p = jnp.pad(a, ((0, n_p - n), (0, n_p - n))).astype(jnp.bfloat16)
    x_p = jnp.pad(x, ((0, n_p - n), (0, c0_p - c0))).astype(jnp.bfloat16)

    flat_params = [t for wb in packed_params for t in wb]
    kernel = functools.partial(_sage_forward_kernel, meta=meta)

    out = pl.pallas_call(
        kernel,
        out_shape=jax.ShapeDtypeStruct((n_p, c_last_p), jnp.float32),
        in_specs=[_VMEM_SPEC] * (2 + len(flat_params)),
        out_specs=_VMEM_SPEC,
        compiler_params=pltpu.CompilerParams(
            vmem_limit_bytes=_VMEM_LIMIT_BYTES),
    )(a_p, x_p, *flat_params)

    return out[:n, :out_channels]


# ---------------------------------------------------------------------------
# Model construction + pure-JAX reference (glue, matches PyTorch eval forward)
# ---------------------------------------------------------------------------
def init_sage_params(key, in_channels, hidden_channels, out_channels, num_layers):
    """Deterministic synthetic parameters mirroring SAGE.__init__ shapes."""
    dims = [in_channels] + [hidden_channels] * (num_layers - 1) + [out_channels]
    params = []
    for li in range(num_layers):
        c_in, c_out = dims[li], dims[li + 1]
        key, k1, k2 = jax.random.split(key, 3)
        wl = jax.random.normal(k1, (c_in, c_out), jnp.float32) / jnp.sqrt(c_in)
        wr = jax.random.normal(k2, (c_in, c_out), jnp.float32) / jnp.sqrt(c_in)
        b = jnp.zeros((1, c_out), jnp.float32)
        # BatchNorm1d defaults: weight=1, bias=0, running_mean=0, running_var=1
        eps = 1e-5
        gamma = jnp.ones((1, c_out), jnp.float32)
        beta = jnp.zeros((1, c_out), jnp.float32)
        rmean = jnp.zeros((1, c_out), jnp.float32)
        rvar = jnp.ones((1, c_out), jnp.float32)
        scale = gamma / jnp.sqrt(rvar + eps)
        shift = beta - rmean * scale
        params.append(dict(wl=wl, wr=wr, b=b, scale=scale, shift=shift))
    return params


def build_mean_adjacency(edge_index, num_nodes):
    """Dense row-normalized adjacency: A[dst, src] = 1/deg(dst)."""
    src, dst = edge_index[0], edge_index[1]
    a = jnp.zeros((num_nodes, num_nodes), jnp.float32)
    a = a.at[dst, src].add(1.0)
    deg = jnp.sum(a, axis=1, keepdims=True)
    return a / jnp.maximum(deg, 1.0)


def sage_reference(params, x, a):
    """Pure f32 JAX reference of the eval-mode PyTorch forward."""
    num_layers = len(params)
    for i, p in enumerate(params):
        agg = a @ x
        x_new = agg @ p["wl"] + x @ p["wr"] + p["b"]
        if i < num_layers - 1:
            x_new = x_new * p["scale"] + p["shift"]   # BN eval
            x_new = jnp.maximum(x_new, 0.0)           # ReLU; dropout = identity
        x = x_new
    return jax.nn.log_softmax(x, axis=-1)


# ---------------------------------------------------------------------------
if __name__ == "__main__":
    N = 16                 # number of graph nodes
    IN_C, HID_C, OUT_C = 8, 32, 8
    NUM_LAYERS = 3
    E = 40                 # number of edges

    key = jax.random.PRNGKey(0)
    kx, ke, kp = jax.random.split(key, 3)

    x = jax.random.normal(kx, (N, IN_C), jnp.float32)
    edge_index = jax.random.randint(ke, (2, E), 0, N, dtype=jnp.int32)

    params = init_sage_params(kp, IN_C, HID_C, OUT_C, NUM_LAYERS)
    a = build_mean_adjacency(edge_index, N)

    packed, meta = fold_and_pack_params(params)
    out = sage_forward(a, x, packed, meta=meta, out_channels=OUT_C)
    out = jax.block_until_ready(out)

    assert out.shape == (N, OUT_C)
    # log_softmax rows should exponentiate-sum to ~1
    assert jnp.allclose(jnp.sum(jnp.exp(out), axis=-1), 1.0, atol=1e-4)
    # match the pure-f32 reference (loose tol: kernel uses bf16 MXU inputs)
    ref = sage_reference(params, x, a)
    assert jnp.max(jnp.abs(out - ref)) < 0.25

    print("KERNEL_OK")
</pallas_src>

<mosaic_0001>
module attributes {stable_mosaic.version = 11 : i64} {
  func.func @_sage_forward_kernel(%arg0: memref<256x256xbf16, #tpu.memory_space<vmem>>, %arg1: memref<256x128xbf16, #tpu.memory_space<vmem>>, %arg2: memref<128x128xbf16, #tpu.memory_space<vmem>>, %arg3: memref<128x128xbf16, #tpu.memory_space<vmem>>, %arg4: memref<1x128xf32, #tpu.memory_space<vmem>>, %arg5: memref<128x128xbf16, #tpu.memory_space<vmem>>, %arg6: memref<128x128xbf16, #tpu.memory_space<vmem>>, %arg7: memref<1x128xf32, #tpu.memory_space<vmem>>, %arg8: memref<128x128xbf16, #tpu.memory_space<vmem>>, %arg9: memref<128x128xbf16, #tpu.memory_space<vmem>>, %arg10: memref<1x128xf32, #tpu.memory_space<vmem>>, %arg11: memref<256x128xf32, #tpu.memory_space<vmem>>) attributes {dimension_semantics = [], scalar_prefetch = 0 : i64, scratch_operands = 0 : i64, tpu.core_type = #tpu.core_type<tc>} {
    %c0 = arith.constant 0 : index
    %c0_0 = arith.constant 0 : index
    %0 = vector.load %arg0[%c0, %c0_0] : memref<256x256xbf16, #tpu.memory_space<vmem>>, vector<256x256xbf16>
    %c0_1 = arith.constant 0 : index
    %c0_2 = arith.constant 0 : index
    %1 = vector.load %arg1[%c0_1, %c0_2] : memref<256x128xbf16, #tpu.memory_space<vmem>>, vector<256x128xbf16>
    %cst = arith.constant dense<0.000000e+00> : vector<256x128xf32>
    %2 = tpu.matmul %0, %1, %cst {dimension_numbers = #tpu.dot_dimension_numbers<[1], [0], [0], [1], [0, 0, 1, 1], [], []>} : vector<256x256xbf16>, vector<256x128xbf16>, vector<256x128xf32> -> vector<256x128xf32>
    %3 = arith.truncf %2 : vector<256x128xf32> to vector<256x128xbf16>
    %c0_3 = arith.constant 0 : index
    %c0_4 = arith.constant 0 : index
    %4 = vector.load %arg2[%c0_3, %c0_4] : memref<128x128xbf16, #tpu.memory_space<vmem>>, vector<128x128xbf16>
    %cst_5 = arith.constant dense<0.000000e+00> : vector<256x128xf32>
    %5 = tpu.matmul %3, %4, %cst_5 {dimension_numbers = #tpu.dot_dimension_numbers<[1], [0], [0], [1], [0, 0, 1, 1], [], []>} : vector<256x128xbf16>, vector<128x128xbf16>, vector<256x128xf32> -> vector<256x128xf32>
    %c0_6 = arith.constant 0 : index
    %c0_7 = arith.constant 0 : index
    %6 = vector.load %arg3[%c0_6, %c0_7] : memref<128x128xbf16, #tpu.memory_space<vmem>>, vector<128x128xbf16>
    %cst_8 = arith.constant dense<0.000000e+00> : vector<256x128xf32>
    %7 = tpu.matmul %1, %6, %cst_8 {dimension_numbers = #tpu.dot_dimension_numbers<[1], [0], [0], [1], [0, 0, 1, 1], [], []>} : vector<256x128xbf16>, vector<128x128xbf16>, vector<256x128xf32> -> vector<256x128xf32>
    %8 = arith.addf %5, %7 : vector<256x128xf32>
    %c0_9 = arith.constant 0 : index
    %c0_10 = arith.constant 0 : index
    %9 = vector.load %arg4[%c0_9, %c0_10] : memref<1x128xf32, #tpu.memory_space<vmem>>, vector<1x128xf32>
    %10 = vector.broadcast %9 : vector<1x128xf32> to vector<256x128xf32>
    %11 = arith.addf %8, %10 : vector<256x128xf32>
    %cst_11 = arith.constant 0.000000e+00 : f32
    %12 = vector.broadcast %cst_11 : f32 to vector<256x128xf32>
    %13 = arith.maximumf %11, %12 : vector<256x128xf32>
    %14 = arith.truncf %13 : vector<256x128xf32> to vector<256x128xbf16>
    %cst_12 = arith.constant dense<0.000000e+00> : vector<256x128xf32>
    %15 = tpu.matmul %0, %14, %cst_12 {dimension_numbers = #tpu.dot_dimension_numbers<[1], [0], [0], [1], [0, 0, 1, 1], [], []>} : vector<256x256xbf16>, vector<256x128xbf16>, vector<256x128xf32> -> vector<256x128xf32>
    %16 = arith.truncf %15 : vector<256x128xf32> to vector<256x128xbf16>
    %c0_13 = arith.constant 0 : index
    %c0_14 = arith.constant 0 : index
    %17 = vector.load %arg5[%c0_13, %c0_14] : memref<128x128xbf16, #tpu.memory_space<vmem>>, vector<128x128xbf16>
    %cst_15 = arith.constant dense<0.000000e+00> : vector<256x128xf32>
    %18 = tpu.matmul %16, %17, %cst_15 {dimension_numbers = #tpu.dot_dimension_numbers<[1], [0], [0], [1], [0, 0, 1, 1], [], []>} : vector<256x128xbf16>, vector<128x128xbf16>, vector<256x128xf32> -> vector<256x128xf32>
    %c0_16 = arith.constant 0 : index
    %c0_17 = arith.constant 0 : index
    %19 = vector.load %arg6[%c0_16, %c0_17] : memref<128x128xbf16, #tpu.memory_space<vmem>>, vector<128x128xbf16>
    %cst_18 = arith.constant dense<0.000000e+00> : vector<256x128xf32>
    %20 = tpu.matmul %14, %19, %cst_18 {dimension_numbers = #tpu.dot_dimension_numbers<[1], [0], [0], [1], [0, 0, 1, 1], [], []>} : vector<256x128xbf16>, vector<128x128xbf16>, vector<256x128xf32> -> vector<256x128xf32>
    %21 = arith.addf %18, %20 : vector<256x128xf32>
    %c0_19 = arith.constant 0 : index
    %c0_20 = arith.constant 0 : index
    %22 = vector.load %arg7[%c0_19, %c0_20] : memref<1x128xf32, #tpu.memory_space<vmem>>, vector<1x128xf32>
    %23 = vector.broadcast %22 : vector<1x128xf32> to vector<256x128xf32>
    %24 = arith.addf %21, %23 : vector<256x128xf32>
    %cst_21 = arith.constant 0.000000e+00 : f32
    %25 = vector.broadcast %cst_21 : f32 to vector<256x128xf32>
    %26 = arith.maximumf %24, %25 : vector<256x128xf32>
    %27 = arith.truncf %26 : vector<256x128xf32> to vector<256x128xbf16>
    %c0_22 = arith.constant 0 : index
    %c0_23 = arith.constant 0 : index
    %28 = vector.load %arg8[%c0_22, %c0_23] : memref<128x128xbf16, #tpu.memory_space<vmem>>, vector<128x128xbf16>
    %cst_24 = arith.constant dense<0.000000e+00> : vector<256x128xf32>
    %29 = tpu.matmul %27, %28, %cst_24 {dimension_numbers = #tpu.dot_dimension_numbers<[1], [0], [0], [1], [0, 0, 1, 1], [], []>} : vector<256x128xbf16>, vector<128x128xbf16>, vector<256x128xf32> -> vector<256x128xf32>
    %c0_25 = arith.constant 0 : index
    %c0_26 = arith.constant 0 : index
    %30 = vector.load %arg9[%c0_25, %c0_26] : memref<128x128xbf16, #tpu.memory_space<vmem>>, vector<128x128xbf16>
    %cst_27 = arith.constant dense<0.000000e+00> : vector<256x128xf32>
    %31 = tpu.matmul %27, %30, %cst_27 {dimension_numbers = #tpu.dot_dimension_numbers<[1], [0], [0], [1], [0, 0, 1, 1], [], []>} : vector<256x128xbf16>, vector<128x128xbf16>, vector<256x128xf32> -> vector<256x128xf32>
    %32 = arith.truncf %29 : vector<256x128xf32> to vector<256x128xbf16>
    %cst_28 = arith.constant dense<0.000000e+00> : vector<256x128xf32>
    %33 = tpu.matmul %0, %32, %cst_28 {dimension_numbers = #tpu.dot_dimension_numbers<[1], [0], [0], [1], [0, 0, 1, 1], [], []>} : vector<256x256xbf16>, vector<256x128xbf16>, vector<256x128xf32> -> vector<256x128xf32>
    %34 = arith.addf %33, %31 : vector<256x128xf32>
    %c0_29 = arith.constant 0 : index
    %c0_30 = arith.constant 0 : index
    %35 = vector.load %arg10[%c0_29, %c0_30] : memref<1x128xf32, #tpu.memory_space<vmem>>, vector<1x128xf32>
    %36 = vector.broadcast %35 : vector<1x128xf32> to vector<256x128xf32>
    %37 = arith.addf %34, %36 : vector<256x128xf32>
    %cst_31 = arith.constant dense<0xFF800000> : vector<256xf32>
    %38 = vector.multi_reduction <maximumf>, %37, %cst_31 [1] : vector<256x128xf32> to vector<256xf32>
    %39 = vector.shape_cast %38 : vector<256xf32> to vector<256x1xf32>
    %40 = vector.broadcast %39 : vector<256x1xf32> to vector<256x128xf32>
    %41 = arith.subf %37, %40 : vector<256x128xf32>
    %42 = math.exp %41 : vector<256x128xf32>
    %cst_32 = arith.constant dense<0.000000e+00> : vector<256xf32>
    %43 = vector.multi_reduction <add>, %42, %cst_32 [1] : vector<256x128xf32> to vector<256xf32>
    %44 = vector.shape_cast %43 : vector<256xf32> to vector<256x1xf32>
    %45 = math.log %44 : vector<256x1xf32>
    %46 = vector.broadcast %45 : vector<256x1xf32> to vector<256x128xf32>
    %47 = arith.subf %41, %46 : vector<256x128xf32>
    %c0_33 = arith.constant 0 : index
    %c0_34 = arith.constant 0 : index
    %48 = vector.load %arg11[%c0_33, %c0_34] : memref<256x128xf32, #tpu.memory_space<vmem>>, vector<256x128xf32>
    tpu.vector_store %arg11[%c0_33, %c0_34], %47 {strides = array<i32>} : memref<256x128xf32, #tpu.memory_space<vmem>>, vector<256x128xf32>,
    return
  }
}

</mosaic_0001>

<bundles_post_ra>
// kernel: sage_forward.1
= control target key start
LH: loop header
LB: loop body
LE: loop exit
PB: predicated region body
PF: predicated region fallthrough
CT: control target
= control target key end

     0   :  { %s5310_s1 = inlined_call_operand.vmem [shape: bf16[256,128], index: 1, kind: input, shape index: {}]   ;;  %s5311_s0 = inlined_call_operand.vmem [shape: bf16[256,256], index: 0, kind: input, shape index: {}]   ;;  %s5312_s3 = inlined_call_operand.vmem [shape: bf16[128,128], index: 3, kind: input, shape index: {}]   ;;  %s5313_s2 = inlined_call_operand.vmem [shape: bf16[128,128], index: 2, kind: input, shape index: {}]   ;;  %s5314_s6 = inlined_call_operand.vmem [shape: bf16[128,128], index: 6, kind: input, shape index: {}]   ;;  %s5315_s4 = inlined_call_operand.vmem [shape: f32[1,128], index: 4, kind: input, shape index: {}]   ;;  %s5316_s5 = inlined_call_operand.vmem [shape: bf16[128,128], index: 5, kind: input, shape index: {}]   ;;  %s5317_s8 = inlined_call_operand.vmem [shape: bf16[128,128], index: 8, kind: input, shape index: {}]   ;;  %s5318_s9 = inlined_call_operand.vmem [shape: bf16[128,128], index: 9, kind: input, shape index: {}]   ;;  %s5319_s7 = inlined_call_operand.vmem [shape: f32[1,128], index: 7, kind: input, shape index: {}]   ;;  %s5320_s10 = inlined_call_operand.vmem [shape: f32[1,128], index: 10, kind: input, shape index: {}]   ;;  %s5321_s11 = inlined_call_operand.vmem [shape: f32[256,128], index: 11, kind: output, shape index: {}]  }
   0x1   :  { %v4091_v0 = vld [vmem:[%s5310_s1 + $0x40] sm:$0xff]   ;;  %v4102_v2 = vld [vmem:[%s5310_s1 + $0x48] sm:$0xff]   ;;  %v4116_v4 = vld [vmem:[%s5310_s1 + $0x50] sm:$0xff]  }
   0x2   :  { %v4096_v1 = vld [vmem:[%s5310_s1] sm:$0xff]   ;;  %2908 = vmatprep.subr.bf16.mxu0 %v4091_v0  ;;  %3676 = vmatprep.subr.bf16.mxu1 %v4091_v0  ;;  %v4109_v3 = vld [vmem:[%s5310_s1 + $0x8] sm:$0xff]   ;;  %v4123_v5 = vld [vmem:[%s5310_s1 + $0x10] sm:$0xff]  }
   0x3   :  { %2909 = vmatpush3.bf16.msra.mxu0 %v4096_v1  ;;  %3684 = vmatpush3.bf16.msra.mxu1 %v4096_v1  ;;  %v4130_v6 = vld [vmem:[%s5310_s1 + $0x58] sm:$0xff]   ;;  %v4144_v8 = vld [vmem:[%s5310_s1 + $0x60] sm:$0xff]   ;;  %v4156_v10 = vld [vmem:[%s5310_s1 + $0x68] sm:$0xff]  }
   0x4   :  { %2910 = vmatprep.subr.bf16.mxu0 %v4102_v2  ;;  %3677 = vmatprep.subr.bf16.mxu1 %v4102_v2  ;;  %v4137_v7 = vld [vmem:[%s5310_s1 + $0x18] sm:$0xff]   ;;  %v4150_v9 = vld [vmem:[%s5310_s1 + $0x20] sm:$0xff]   ;;  %v4171_v12 = vld [vmem:[%s5310_s1 + $0x28] sm:$0xff]  }
   0x5   :  { %v4163_v11 = vld [vmem:[%s5311_s0 + $0x4] ss:$8 sps:$4 sm:$0xff]   ;;  %v4178_v13 = vld [vmem:[%s5310_s1 + $0x70] sm:$0xff]   ;;  %v4195_v16 = vld [vmem:[%s5310_s1 + $0x78] sm:$0xff]  }
   0x6   :  { %391 = vmatprep.mubr.bf16.mxu0 %v4163_v11  ;;  %v4185_v14 = vld [vmem:[%s5310_s1 + $0x30] sm:$0xff]   ;;  %v3786_v15 = vld [vmem:[%s5311_s0 + $0x84] ss:$8 sps:$4 sm:$0xff]   ;;  %v4202_v17 = vld [vmem:[%s5310_s1 + $0x38] sm:$0xff]  }
   0x7   :  { %2911 = vmatpush3.bf16.msra.mxu0 %v4109_v3  ;;  %3685 = vmatpush3.bf16.msra.mxu1 %v4109_v3  ;;  %v4210_v18 = vld [vmem:[%s5311_s0] ss:$8 sps:$4 sm:$0xff]   ;;  %v4219_v20 = vld [vmem:[%s5311_s0 + $0x14] ss:$8 sps:$4 sm:$0xff]   ;;  %v4230_v22 = vld [vmem:[%s5311_s0 + $0x10] ss:$8 sps:$4 sm:$0xff]  }
   0x8   :  { %2912 = vmatprep.subr.bf16.mxu0 %v4116_v4  ;;  %3678 = vmatprep.subr.bf16.mxu1 %v4116_v4  ;;  %v3789_v19 = vld [vmem:[%s5311_s0 + $0x80] ss:$8 sps:$4 sm:$0xff]   ;;  %v3792_v21 = vld [vmem:[%s5311_s0 + $0x94] ss:$8 sps:$4 sm:$0xff]   ;;  %v4235_v23 = vld [vmem:[%s5311_s0 + $0x24] ss:$8 sps:$4 sm:$0xff]  }
   0x9   :  { %455 = vmatprep.mubr.bf16.mxu1 %v3786_v15  ;;  %v3795_v24 = vld [vmem:[%s5311_s0 + $0x90] ss:$8 sps:$4 sm:$0xff]   ;;  %v3820_v25 = vld [vmem:[%s5312_s3] sm:$0xff]   ;;  %v3821_v27 = vld [vmem:[%s5312_s3 + $0x8] sm:$0xff]  }
   0xa   :  { %v4246_v26 = vld [vmem:[%s5311_s0 + $0xa4] ss:$8 sps:$4 sm:$0xff]   ;;  %v3822_v28 = vld [vmem:[%s5312_s3 + $0x10] sm:$0xff]   ;;  %v4260_v29 = vld [vmem:[%s5311_s0 + $0x20] ss:$8 sps:$4 sm:$0xff]  }
   0xb   :  { %2913 = vmatpush3.bf16.msra.mxu0 %v4123_v5  ;;  %3686 = vmatpush3.bf16.msra.mxu1 %v4123_v5  ;;  %v4265_v30 = vld [vmem:[%s5311_s0 + $0x34] ss:$8 sps:$4 sm:$0xff]   ;;  %v4270_v31 = vld [vmem:[%s5311_s0 + $0xa0] ss:$8 sps:$4 sm:$0xff]   ;;  %v4290_v35 = vld [vmem:[%s5311_s0 + $0x30] ss:$8 sps:$4 sm:$0xff]  }
   0xc   :  { %2914 = vmatprep.subr.bf16.mxu0 %v4130_v6  ;;  %3679 = vmatprep.subr.bf16.mxu1 %v4130_v6  ;;  %v4275_v32 = vld [vmem:[%s5311_s0 + $0xb4] ss:$8 sps:$4 sm:$0xff]   ;;  %v3824_v34 = vld [vmem:[%s5312_s3 + $0x20] sm:$0xff]   ;;  %v4295_v36 = vld [vmem:[%s5311_s0 + $0xb0] ss:$8 sps:$4 sm:$0xff]  }
   0xd   :  { %v3823_v33 = vld [vmem:[%s5312_s3 + $0x18] sm:$0xff]   ;;  %v4300_v37 = vld [vmem:[%s5311_s0 + $0x44] ss:$8 sps:$4 sm:$0xff]   ;;  %v3826_v40 = vld [vmem:[%s5312_s3 + $0x30] sm:$0xff]  }
   0xe   :  { %v4305_v38 = vld [vmem:[%s5311_s0 + $0xc4] ss:$8 sps:$4 sm:$0xff]   ;;  %v4320_v41 = vld [vmem:[%s5311_s0 + $0x40] ss:$8 sps:$4 sm:$0xff]   ;;  %v4330_v43 = vld [vmem:[%s5311_s0 + $0x54] ss:$8 sps:$4 sm:$0xff]  }
   0xf   :  { %2915 = vmatpush3.bf16.msra.mxu0 %v4137_v7  ;;  %3687 = vmatpush3.bf16.msra.mxu1 %v4137_v7  ;;  %v3825_v39 = vld [vmem:[%s5312_s3 + $0x28] sm:$0xff]   ;;  %v4335_v44 = vld [vmem:[%s5311_s0 + $0xd4] ss:$8 sps:$4 sm:$0xff]   ;;  %v3828_v46 = vld [vmem:[%s5313_s2] sm:$0xff]  }
  0x10   :  { %2916 = vmatprep.subr.bf16.mxu0 %v4144_v8  ;;  %3680 = vmatprep.subr.bf16.mxu1 %v4144_v8  ;;  %v4325_v42 = vld [vmem:[%s5311_s0 + $0xc0] ss:$8 sps:$4 sm:$0xff]   ;;  %v3827_v45 = vld [vmem:[%s5312_s3 + $0x38] sm:$0xff]   ;;  %v4360_v49 = vld [vmem:[%s5311_s0 + $0x64] ss:$8 sps:$4 sm:$0xff]  }
  0x11   :  { %v4350_v47 = vld [vmem:[%s5311_s0 + $0x50] ss:$8 sps:$4 sm:$0xff]   ;;  %v4365_v50 = vld [vmem:[%s5311_s0 + $0xe4] ss:$8 sps:$4 sm:$0xff]   ;;  %v4374_v51 = vld [vmem:[%s5311_s0 + $0x60] ss:$8 sps:$4 sm:$0xff]  }
  0x12   :  { %v4355_v48 = vld [vmem:[%s5311_s0 + $0xd0] ss:$8 sps:$4 sm:$0xff]   ;;  %v4379_v52 = vld [vmem:[%s5311_s0 + $0xe0] ss:$8 sps:$4 sm:$0xff]   ;;  %v4384_v53 = vld [vmem:[%s5311_s0 + $0x74] ss:$8 sps:$4 sm:$0xff]  }
  0x13   :  { %2917 = vmatpush3.bf16.msra.mxu0 %v4150_v9  ;;  %3688 = vmatpush3.bf16.msra.mxu1 %v4150_v9  ;;  %v4389_v54 = vld [vmem:[%s5311_s0 + $0xf4] ss:$8 sps:$4 sm:$0xff]   ;;  %v4398_v55 = vld [vmem:[%s5311_s0 + $0x70] ss:$8 sps:$4 sm:$0xff]   ;;  %v3829_v57 = vld [vmem:[%s5313_s2 + $0x8] sm:$0xff]  }
  0x14   :  { %2918 = vmatprep.subr.bf16.mxu0 %v4156_v10  ;;  %3681 = vmatprep.subr.bf16.mxu1 %v4156_v10  ;;  %v4403_v56 = vld [vmem:[%s5311_s0 + $0xf0] ss:$8 sps:$4 sm:$0xff]   ;;  %v3832_v60 = vld [vmem:[%s5313_s2 + $0x20] sm:$0xff]   ;;  %v3833_v61 = vld [vmem:[%s5313_s2 + $0x28] sm:$0xff]  }
  0x15   :  { %v3830_v58 = vld [vmem:[%s5313_s2 + $0x10] sm:$0xff]   ;;  %v3831_v59 = vld [vmem:[%s5313_s2 + $0x18] sm:$0xff]  }
  0x16   :  { %v3834_v62 = vld [vmem:[%s5313_s2 + $0x30] sm:$0xff]   ;;  %v3835_v63 = vld [vmem:[%s5313_s2 + $0x38] sm:$0xff]  }
  0x17   :  { %2919 = vmatpush3.bf16.msra.mxu0 %v4171_v12  ;;  %3689 = vmatpush3.bf16.msra.mxu1 %v4171_v12 }
  0x18   :  { %2920 = vmatprep.subr.bf16.mxu0 %v4178_v13  ;;  %3682 = vmatprep.subr.bf16.mxu1 %v4178_v13 }
  0x1b   :  { %2921 = vmatpush3.bf16.msra.mxu0 %v4185_v14  ;;  %3690 = vmatpush3.bf16.msra.mxu1 %v4185_v14 }
  0x1c   :  { %2922 = vmatprep.subr.bf16.mxu0 %v4195_v16  ;;  %3683 = vmatprep.subr.bf16.mxu1 %v4195_v16 }
  0x1f   :  { %2923 = vmatpush3.bf16.msra.mxu0 %v4202_v17  ;;  %3691 = vmatpush3.bf16.msra.mxu1 %v4202_v17 }
  0x20   :  { %3388 = vmatprep.subr.bf16.mxu1 %v3820_v25 }
  0x22   :  { %392 = vmatmul.mubr.bf16.vlgmr.msra.gmra.mrb[0].mxu0 %v4210_v18  ;;  %456 = vmatmul.mubr.bf16.vlgmr.msra.gmra.mrb[0].mxu1 %v3789_v19 }
  0x23   :  { %399 = vmatprep.mubr.bf16.mxu0 %v4219_v20  ;;  %463 = vmatprep.mubr.bf16.mxu1 %v3792_v21 }
  0x24   :  { %3389 = vmatpush3.bf16.msra.mxu1 %v3820_v25 }
  0x25   :  { %3390 = vmatprep.subr.bf16.mxu1 %v3821_v27 }
  0x28   :  { %3391 = vmatpush3.bf16.msra.mxu1 %v3821_v27 }
  0x29   :  { %3392 = vmatprep.subr.bf16.mxu1 %v3822_v28 }
  0x2a   :  { %400 = vmatmul.mubr.bf16.gmra.mrb[4].mxu0 %v4230_v22  ;;  %464 = vmatmul.mubr.bf16.gmra.mrb[4].mxu1 %v3795_v24 }
  0x2b   :  { %407 = vmatprep.mubr.bf16.mxu0 %v4235_v23  ;;  %471 = vmatprep.mubr.bf16.mxu1 %v4246_v26 }
  0x2c   :  { %3393 = vmatpush3.bf16.msra.mxu1 %v3822_v28 }
  0x2d   :  { %3394 = vmatprep.subr.bf16.mxu1 %v3823_v33 }
  0x30   :  { %3395 = vmatpush3.bf16.msra.mxu1 %v3823_v33 }
  0x31   :  { %3396 = vmatprep.subr.bf16.mxu1 %v3824_v34 }
  0x32   :  { %408 = vmatmul.mubr.bf16.gmra.mrb[8].mxu0 %v4260_v29  ;;  %472 = vmatmul.mubr.bf16.gmra.mrb[8].mxu1 %v4270_v31 }
  0x33   :  { %415 = vmatprep.mubr.bf16.mxu0 %v4265_v30  ;;  %479 = vmatprep.mubr.bf16.mxu1 %v4275_v32 }
  0x34   :  { %3397 = vmatpush3.bf16.msra.mxu1 %v3824_v34 }
  0x35   :  { %3398 = vmatprep.subr.bf16.mxu1 %v3825_v39 }
  0x38   :  { %3399 = vmatpush3.bf16.msra.mxu1 %v3825_v39 }
  0x39   :  { %3400 = vmatprep.subr.bf16.mxu1 %v3826_v40 }
  0x3a   :  { %416 = vmatmul.mubr.bf16.gmra.mrb[12].mxu0 %v4290_v35  ;;  %480 = vmatmul.mubr.bf16.gmra.mrb[12].mxu1 %v4295_v36 }
  0x3b   :  { %423 = vmatprep.mubr.bf16.mxu0 %v4300_v37  ;;  %487 = vmatprep.mubr.bf16.mxu1 %v4305_v38 }
  0x3c   :  { %3401 = vmatpush3.bf16.msra.mxu1 %v3826_v40 }
  0x3d   :  { %3402 = vmatprep.subr.bf16.mxu1 %v3827_v45 }
  0x40   :  { %3403 = vmatpush3.bf16.msra.mxu1 %v3827_v45 }
  0x41   :  { %3436 = vmatprep.subr.bf16.mxu1 %v3828_v46 }
  0x42   :  { %424 = vmatmul.mubr.bf16.gmra.mrb[16].mxu0 %v4320_v41  ;;  %488 = vmatmul.mubr.bf16.gmra.mrb[16].mxu1 %v4325_v42 }
  0x43   :  { %431 = vmatprep.mubr.bf16.mxu0 %v4330_v43  ;;  %495 = vmatprep.mubr.bf16.mxu1 %v4335_v44 }
  0x4a   :  { %432 = vmatmul.mubr.bf16.gmra.mrb[20].mxu0 %v4350_v47  ;;  %496 = vmatmul.mubr.bf16.gmra.mrb[20].mxu1 %v4355_v48 }
  0x4b   :  { %439 = vmatprep.mubr.bf16.mxu0 %v4360_v49  ;;  %503 = vmatprep.mubr.bf16.mxu1 %v4365_v50 }
  0x52   :  { %440 = vmatmul.mubr.bf16.gmra.mrb[24].mxu0 %v4374_v51  ;;  %504 = vmatmul.mubr.bf16.gmra.mrb[24].mxu1 %v4379_v52 }
  0x53   :  { %447 = vmatprep.mubr.bf16.mxu0 %v4384_v53  ;;  %511 = vmatprep.mubr.bf16.mxu1 %v4389_v54 }
  0x5a   :  { %448 = vmatmul.mubr.bf16.gmra.mrb[28].mxu0 %v4398_v55  ;;  %512 = vmatmul.mubr.bf16.gmra.mrb[28].mxu1 %v4403_v56 }
  0x5b   :  { %3404 = vmatprep.mubr.bf16.mxu1 %v4096_v1  ;;  %1105 = vmatprep.mubr.bf16.mxu0 %v4163_v11 }
  0x62   :  { %3405 = vmatmul.mubr.bf16.vlgmr.msra.gmra.mrb[32].mxu1 %v4109_v3 }
  0x63   :  { %3408 = vmatprep.mubr.bf16.mxu1 %v4123_v5  ;;  %3437 = vmatpush3.bf16.msra.mxu1 %v3828_v46  ;;  %v3837_v46 = vld [vmem:[%s5314_s6 + $0x8] sm:$0xff]  }
  0x64   :  { %3438 = vmatprep.subr.bf16.mxu1 %v3829_v57 }
  0x67   :  { %3439 = vmatpush3.bf16.msra.mxu1 %v3829_v57 }
  0x68   :  { %3440 = vmatprep.subr.bf16.mxu1 %v3830_v58 }
  0x6a   :  { %3409 = vmatmul.mubr.bf16.gmra.mrb[36].mxu1 %v4137_v7 }
  0x6b   :  { %3412 = vmatprep.mubr.bf16.mxu1 %v4150_v9  ;;  %3441 = vmatpush3.bf16.msra.mxu1 %v3830_v58 }
  0x6c   :  { %3442 = vmatprep.subr.bf16.mxu1 %v3831_v59 }
  0x6f   :  { %3443 = vmatpush3.bf16.msra.mxu1 %v3831_v59 }
  0x70   :  { %3444 = vmatprep.subr.bf16.mxu1 %v3832_v60 }
  0x72   :  { %3413 = vmatmul.mubr.bf16.gmra.mrb[40].mxu1 %v4171_v12 }
  0x73   :  { %3416 = vmatprep.mubr.bf16.mxu1 %v4185_v14  ;;  %3445 = vmatpush3.bf16.msra.mxu1 %v3832_v60 }
  0x74   :  { %3446 = vmatprep.subr.bf16.mxu1 %v3833_v61 }
  0x77   :  { %3447 = vmatpush3.bf16.msra.mxu1 %v3833_v61 }
  0x78   :  { %3448 = vmatprep.subr.bf16.mxu1 %v3834_v62 }
  0x7a   :  { %3417 = vmatmul.mubr.bf16.gmra.mrb[44].mxu1 %v4202_v17 }
  0x7b   :  { %3420 = vmatprep.mubr.bf16.mxu1 %v4091_v0  ;;  %3449 = vmatpush3.bf16.msra.mxu1 %v3834_v62  ;;  %v3836_v0 = vld [vmem:[%s5314_s6] sm:$0xff]  }
  0x7c   :  { %3450 = vmatprep.subr.bf16.mxu1 %v3835_v63 }
  0x7f   :  { %3451 = vmatpush3.bf16.msra.mxu1 %v3835_v63 }
  0x80   :  { %3484 = vmatprep.subr.bf16.mxu1 %v3836_v0 }
  0x82   :  { %3421 = vmatmul.mubr.bf16.gmra.mrb[48].mxu1 %v4102_v2 }
  0x83   :  { %3424 = vmatprep.mubr.bf16.mxu1 %v4116_v4 }
  0x8a   :  { %3425 = vmatmul.mubr.bf16.gmra.mrb[52].mxu1 %v4130_v6 }
  0x8b   :  { %3428 = vmatprep.mubr.bf16.mxu1 %v4144_v8 }
  0x92   :  { %3429 = vmatmul.mubr.bf16.gmra.mrb[56].mxu1 %v4156_v10 }
  0x93   :  { %3432 = vmatprep.mubr.bf16.mxu1 %v4178_v13 }
  0x9a   :  { %3433 = vmatmul.mubr.bf16.gmra.mrb[60].mxu1 %v4195_v16 }
  0xf5   :  { %v2924_v1 = vpop.f32.mrb[0].mxu0  ;;  %v2972_v2 = vpop.f32.mrb[0].mxu1 }
  0xf6   :  { %v2925_v3 = vpop.f32.mrb[1].mxu0  ;;  %v2973_v4 = vpop.f32.mrb[1].mxu1 }
  0xf7   :  { %v2926_v5 = vadd.f32 %v2925_v3, %v2924_v1  ;;  %v2927_v7 = vpop.f32.mrb[2].mxu0  ;;  %v4448_v6 = vadd.f32 %v2973_v4, %v2972_v2  ;;  %v2975_v8 = vpop.f32.mrb[2].mxu1  ;;  %v3838_v2 = vld [vmem:[%s5314_s6 + $0x10] sm:$0xff]  }
  0xf8   :  { %v2928_v9 = vpop.f32.mrb[3].mxu0  ;;  %v2976_v10 = vpop.f32.mrb[3].mxu1 }
  0xf9   :  { %v2929_v11 = vadd.f32 %v2928_v9, %v2927_v7  ;;  %v4450_v12 = vadd.f32 %v2976_v10, %v2975_v8  ;;  %v3839_v9 = vld [vmem:[%s5314_s6 + $0x18] sm:$0xff]  }
  0xfb   :  { %v520_v13 = vpack.c.bf16 %v2929_v11, %v2926_v5  ;;  %v528_v14 = vpack.c.bf16 %v4450_v12, %v4448_v6  ;;  %v3842_v6 = vld [vmem:[%s5314_s6 + $0x30] sm:$0xff]   ;;  %v3843_v12 = vld [vmem:[%s5314_s6 + $0x38] sm:$0xff]  }
  0xfd   :  { %v2930_v15 = vpop.f32.mrb[4].mxu0  ;;  %3452 = vmatprep.mubr.bf16.mxu1 %v520_v13  ;;  %v2978_v16 = vpop.f32.mrb[4].mxu1 }
  0xfe   :  { %v2931_v17 = vpop.f32.mrb[5].mxu0  ;;  %v2979_v19 = vpop.f32.mrb[5].mxu1 }
  0xff   :  { %v2932_v21 = vadd.f32 %v2931_v17, %v2930_v15  ;;  %v2933_v24 = vpop.f32.mrb[6].mxu0  ;;  %v4454_v25 = vadd.f32 %v2979_v19, %v2978_v16  ;;  %v2981_v27 = vpop.f32.mrb[6].mxu1 }
 0x100   :  { %v2934_v28 = vpop.f32.mrb[7].mxu0  ;;  %v2982_v33 = vpop.f32.mrb[7].mxu1 }
 0x101   :  { %v2935_v34 = vadd.f32 %v2934_v28, %v2933_v24  ;;  %v4456_v39 = vadd.f32 %v2982_v33, %v2981_v27  ;;  %v3840_v24 = vld [vmem:[%s5314_s6 + $0x20] sm:$0xff]  }
 0x103   :  { %v521_v40 = vpack.c.bf16 %v2935_v34, %v2932_v21  ;;  %v529_v45 = vpack.c.bf16 %v4456_v39, %v4454_v25 }
 0x105   :  { %v2936_v57 = vpop.f32.mrb[8].mxu0  ;;  %3453 = vmatmul.mubr.bf16.vlgmr.msra.gmra.mrb[32].mxu1 %v521_v40  ;;  %v2984_v58 = vpop.f32.mrb[8].mxu1 }
 0x106   :  { %v2937_v59 = vpop.f32.mrb[9].mxu0  ;;  %v2985_v60 = vpop.f32.mrb[9].mxu1  ;;  %3485 = vmatpush3.bf16.msra.mxu1 %v3836_v0 }
 0x107   :  { %v2938_v61 = vadd.f32 %v2937_v59, %v2936_v57  ;;  %v2939_v62 = vpop.f32.mrb[10].mxu0  ;;  %v4463_v63 = vadd.f32 %v2985_v60, %v2984_v58  ;;  %v2987_v1 = vpop.f32.mrb[10].mxu1  ;;  %3486 = vmatprep.subr.bf16.mxu1 %v3837_v46  ;;  %v3841_v57 = vld [vmem:[%s5314_s6 + $0x28] sm:$0xff]  }
 0x108   :  { %v2940_v3 = vpop.f32.mrb[11].mxu0  ;;  %v2988_v4 = vpop.f32.mrb[11].mxu1 }
 0x109   :  { %v2941_v5 = vadd.f32 %v2940_v3, %v2939_v62  ;;  %v4468_v7 = vadd.f32 %v2988_v4, %v2987_v1 }
 0x10a   :  { %3487 = vmatpush3.bf16.msra.mxu1 %v3837_v46 }
 0x10b   :  { %v522_v8 = vpack.c.bf16 %v2941_v5, %v2938_v61  ;;  %v530_v0 = vpack.c.bf16 %v4468_v7, %v4463_v63  ;;  %3488 = vmatprep.subr.bf16.mxu1 %v3838_v2 }
 0x10d   :  { %v2942_v10 = vpop.f32.mrb[12].mxu0  ;;  %3456 = vmatprep.mubr.bf16.mxu1 %v522_v8  ;;  %v2990_v11 = vpop.f32.mrb[12].mxu1 }
 0x10e   :  { %v2943_v13 = vpop.f32.mrb[13].mxu0  ;;  %v2991_v15 = vpop.f32.mrb[13].mxu1  ;;  %3489 = vmatpush3.bf16.msra.mxu1 %v3838_v2 }
 0x10f   :  { %v2944_v16 = vadd.f32 %v2943_v13, %v2942_v10  ;;  %v2945_v17 = vpop.f32.mrb[14].mxu0  ;;  %v4475_v19 = vadd.f32 %v2991_v15, %v2990_v11  ;;  %v2993_v21 = vpop.f32.mrb[14].mxu1  ;;  %3490 = vmatprep.subr.bf16.mxu1 %v3839_v9 }
 0x110   :  { %v2946_v27 = vpop.f32.mrb[15].mxu0  ;;  %v2994_v28 = vpop.f32.mrb[15].mxu1 }
 0x111   :  { %v2947_v33 = vadd.f32 %v2946_v27, %v2945_v17  ;;  %v4480_v34 = vadd.f32 %v2994_v28, %v2993_v21 }
 0x112   :  { %3491 = vmatpush3.bf16.msra.mxu1 %v3839_v9 }
 0x113   :  { %v523_v40 = vpack.c.bf16 %v2947_v33, %v2944_v16  ;;  %3492 = vmatprep.subr.bf16.mxu1 %v3840_v24 }
 0x115   :  { %v2948_v58 = vpop.f32.mrb[16].mxu0  ;;  %3457 = vmatmul.mubr.bf16.gmra.mrb[36].mxu1 %v523_v40  ;;  %v2996_v59 = vpop.f32.mrb[16].mxu1 }
 0x116   :  { %v2949_v60 = vpop.f32.mrb[17].mxu0  ;;  %v2997_v61 = vpop.f32.mrb[17].mxu1  ;;  %3493 = vmatpush3.bf16.msra.mxu1 %v3840_v24 }
 0x117   :  { %v2950_v62 = vadd.f32 %v2949_v60, %v2948_v58  ;;  %v2951_v1 = vpop.f32.mrb[18].mxu0  ;;  %v2998_v2 = vadd.f32 %v2997_v61, %v2996_v59  ;;  %v2999_v3 = vpop.f32.mrb[18].mxu1  ;;  %3494 = vmatprep.subr.bf16.mxu1 %v3841_v57 }
 0x118   :  { %v2952_v4 = vpop.f32.mrb[19].mxu0  ;;  %v3000_v5 = vpop.f32.mrb[19].mxu1 }
 0x119   :  { %v2953_v8 = vadd.f32 %v2952_v4, %v2951_v1  ;;  %v3001_v9 = vadd.f32 %v3000_v5, %v2999_v3 }
 0x11a   :  { %3495 = vmatpush3.bf16.msra.mxu1 %v3841_v57 }
 0x11b   :  { %v524_v10 = vpack.c.bf16 %v2953_v8, %v2950_v62  ;;  %v532_v11 = vpack.c.bf16 %v3001_v9, %v2998_v2  ;;  %3496 = vmatprep.subr.bf16.mxu1 %v3842_v6 }
 0x11d   :  { %v2954_v13 = vpop.f32.mrb[20].mxu0  ;;  %3460 = vmatprep.mubr.bf16.mxu1 %v524_v10  ;;  %v3002_v15 = vpop.f32.mrb[20].mxu1 }
 0x11e   :  { %v2955_v16 = vpop.f32.mrb[21].mxu0  ;;  %v3003_v17 = vpop.f32.mrb[21].mxu1  ;;  %3497 = vmatpush3.bf16.msra.mxu1 %v3842_v6 }
 0x11f   :  { %v2956_v21 = vadd.f32 %v2955_v16, %v2954_v13  ;;  %v2957_v27 = vpop.f32.mrb[22].mxu0  ;;  %v3004_v24 = vadd.f32 %v3003_v17, %v3002_v15  ;;  %v3005_v28 = vpop.f32.mrb[22].mxu1  ;;  %3498 = vmatprep.subr.bf16.mxu1 %v3843_v12 }
 0x120   :  { %v2958_v33 = vpop.f32.mrb[23].mxu0  ;;  %v3006_v40 = vpop.f32.mrb[23].mxu1 }
 0x121   :  { %v2959_v58 = vadd.f32 %v2958_v33, %v2957_v27  ;;  %v3007_v59 = vadd.f32 %v3006_v40, %v3005_v28 }
 0x122   :  { %3499 = vmatpush3.bf16.msra.mxu1 %v3843_v12 }
 0x123   :  { %v525_v60 = vpack.c.bf16 %v2959_v58, %v2956_v21  ;;  %v533_v61 = vpack.c.bf16 %v3007_v59, %v3004_v24 }
 0x125   :  { %v2960_v1 = vpop.f32.mrb[24].mxu0  ;;  %3461 = vmatmul.mubr.bf16.gmra.mrb[40].mxu1 %v525_v60  ;;  %v3008_v57 = vpop.f32.mrb[24].mxu1 }
 0x126   :  { %v2961_v62 = vpop.f32.mrb[25].mxu0  ;;  %v3009_v2 = vpop.f32.mrb[25].mxu1 }
 0x127   :  { %v2962_v3 = vadd.f32 %v2961_v62, %v2960_v1  ;;  %v2963_v4 = vpop.f32.mrb[26].mxu0  ;;  %v3010_v5 = vadd.f32 %v3009_v2, %v3008_v57  ;;  %v3011_v8 = vpop.f32.mrb[26].mxu1 }
 0x128   :  { %v2964_v9 = vpop.f32.mrb[27].mxu0  ;;  %v3012_v10 = vpop.f32.mrb[27].mxu1 }
 0x129   :  { %v2965_v13 = vadd.f32 %v2964_v9, %v2963_v4  ;;  %v3013_v15 = vadd.f32 %v3012_v10, %v3011_v8 }
 0x12b   :  { %v526_v16 = vpack.c.bf16 %v2965_v13, %v2962_v3  ;;  %v534_v17 = vpack.c.bf16 %v3013_v15, %v3010_v5 }
 0x12d   :  { %v2966_v46 = vpop.f32.mrb[28].mxu0  ;;  %3464 = vmatprep.mubr.bf16.mxu1 %v526_v16  ;;  %v3014_v27 = vpop.f32.mrb[28].mxu1 }
 0x12e   :  { %v2967_v21 = vpop.f32.mrb[29].mxu0  ;;  %v3015_v24 = vpop.f32.mrb[29].mxu1 }
 0x12f   :  { %v2968_v28 = vadd.f32 %v2967_v21, %v2966_v46  ;;  %v2969_v33 = vpop.f32.mrb[30].mxu0  ;;  %v3016_v40 = vadd.f32 %v3015_v24, %v3014_v27  ;;  %v3017_v58 = vpop.f32.mrb[30].mxu1  ;;  %v5322_v46 = vpack.c.bf16 %v4480_v34, %v4475_v19 }
 0x130   :  { %v2970_v59 = vpop.f32.mrb[31].mxu0  ;;  %v3018_v60 = vpop.f32.mrb[31].mxu1 }
 0x131   :  { %v2971_v1 = vadd.f32 %v2970_v59, %v2969_v33  ;;  %v3019_v57 = vadd.f32 %v3018_v60, %v3017_v58 }
 0x133   :  { %v527_v62 = vpack.c.bf16 %v2971_v1, %v2968_v28  ;;  %v535_v2 = vpack.c.bf16 %v3019_v57, %v3016_v40 }
 0x135   :  { %3465 = vmatmul.mubr.bf16.gmra.mrb[44].mxu1 %v527_v62 }
 0x136   :  { %3468 = vmatprep.mubr.bf16.mxu1 %v528_v14  ;;  %v4508_v14 = vld [vmem:[%s5315_s4] ss:$0 sm:$0xff] }
 0x13d   :  { %3469 = vmatmul.mubr.bf16.gmra.mrb[48].mxu1 %v529_v45 }
 0x13e   :  { %3472 = vmatprep.mubr.bf16.mxu1 %v530_v0 }
 0x145   :  { %3473 = vmatmul.mubr.bf16.gmra.mrb[52].mxu1 %v5322_v46 }
 0x146   :  { %3476 = vmatprep.mubr.bf16.mxu1 %v532_v11 }
 0x14d   :  { %3477 = vmatmul.mubr.bf16.gmra.mrb[56].mxu1 %v533_v61 }
 0x14e   :  { %3480 = vmatprep.mubr.bf16.mxu1 %v534_v17 }
 0x155   :  { %3481 = vmatmul.mubr.bf16.gmra.mrb[60].mxu1 %v535_v2 }
 0x1d8   :  { %v3454_v25 = vpop.f32.mrb[32].mxu1 }
 0x1d9   :  { %v995_v39 = vadd.f32 %v3454_v25, %v4508_v14  ;;  %v859_v45 = vpop.f32.mrb[33].mxu1 }
 0x1da   :  { %v993_v63 = vadd.f32 %v4508_v14, %v859_v45  ;;  %v3455_v7 = vpop.f32.mrb[34].mxu1 }
 0x1db   :  { %v996_v0 = vadd.f32 %v3455_v7, %v4508_v14  ;;  %v862_v19 = vpop.f32.mrb[35].mxu1  ;;  %v1027_v11 = vmax.f32 %v995_v39, 0.0 }
 0x1dc   :  { %v994_v34 = vadd.f32 %v4508_v14, %v862_v19  ;;  %v1025_v3 = vmax.f32 %v993_v63, 0.0 }
 0x1dd   :  { %v1028_v61 = vmax.f32 %v996_v0, 0.0 }
 0x1de   :  { %v1026_v4 = vmax.f32 %v994_v34, 0.0 }
 0x1df   :  { %v4514_v5 = vpack.c.bf16 %v1028_v61, %v1027_v11 }
 0x1e0   :  { %v4516_v8 = vpack.c.bf16 %v1026_v4, %v1025_v3 }
 0x1e2   :  { %3500 = vmatprep.mubr.bf16.mxu1 %v4516_v8 }
 0x1e3   :  { %3501 = vmatmul.mubr.bf16.vlgmr.msra.gmra.mrb[64].mxu1 %v4514_v5 }
 0x1e8   :  { %v3458_v9 = vpop.f32.mrb[36].mxu1 }
 0x1e9   :  { %v999_v10 = vadd.f32 %v3458_v9, %v4508_v14  ;;  %v875_v13 = vpop.f32.mrb[37].mxu1 }
 0x1ea   :  { %v997_v15 = vadd.f32 %v4508_v14, %v875_v13  ;;  %v3459_v16 = vpop.f32.mrb[38].mxu1 }
 0x1eb   :  { %v1000_v17 = vadd.f32 %v3459_v16, %v4508_v14  ;;  %v878_v27 = vpop.f32.mrb[39].mxu1  ;;  %v1031_v24 = vmax.f32 %v999_v10, 0.0 }
 0x1ec   :  { %v998_v21 = vadd.f32 %v4508_v14, %v878_v27  ;;  %v1029_v33 = vmax.f32 %v997_v15, 0.0 }
 0x1ed   :  { %v1032_v28 = vmax.f32 %v1000_v17, 0.0 }
 0x1ee   :  { %v1030_v40 = vmax.f32 %v998_v21, 0.0 }
 0x1ef   :  { %v4524_v58 = vpack.c.bf16 %v1032_v28, %v1031_v24 }
 0x1f0   :  { %v4526_v59 = vpack.c.bf16 %v1030_v40, %v1029_v33 }
 0x1f2   :  { %3504 = vmatprep.mubr.bf16.mxu1 %v4526_v59 }
 0x1f3   :  { %3505 = vmatmul.mubr.bf16.gmra.mrb[68].mxu1 %v4524_v58 }
 0x1f8   :  { %v3462_v60 = vpop.f32.mrb[40].mxu1 }
 0x1f9   :  { %v1003_v1 = vadd.f32 %v3462_v60, %v4508_v14  ;;  %v891_v57 = vpop.f32.mrb[41].mxu1 }
 0x1fa   :  { %v1001_v62 = vadd.f32 %v4508_v14, %v891_v57  ;;  %v3463_v2 = vpop.f32.mrb[42].mxu1 }
 0x1fb   :  { %v1004_v46 = vadd.f32 %v3463_v2, %v4508_v14  ;;  %v894_v6 = vpop.f32.mrb[43].mxu1  ;;  %v1035_v25 = vmax.f32 %v1003_v1, 0.0 }
 0x1fc   :  { %v1002_v12 = vadd.f32 %v4508_v14, %v894_v6  ;;  %v1033_v45 = vmax.f32 %v1001_v62, 0.0 }
 0x1fd   :  { %v1036_v39 = vmax.f32 %v1004_v46, 0.0 }
 0x1fe   :  { %v1034_v63 = vmax.f32 %v1002_v12, 0.0 }
 0x1ff   :  { %v4534_v7 = vpack.c.bf16 %v1036_v39, %v1035_v25 }
 0x200   :  { %v4536_v0 = vpack.c.bf16 %v1034_v63, %v1033_v45 }
 0x202   :  { %3508 = vmatprep.mubr.bf16.mxu1 %v4536_v0 }
 0x203   :  { %3509 = vmatmul.mubr.bf16.gmra.mrb[72].mxu1 %v4534_v7 }
 0x208   :  { %v3466_v19 = vpop.f32.mrb[44].mxu1 }
 0x209   :  { %v1007_v34 = vadd.f32 %v3466_v19, %v4508_v14  ;;  %v907_v11 = vpop.f32.mrb[45].mxu1 }
 0x20a   :  { %v1005_v61 = vadd.f32 %v4508_v14, %v907_v11  ;;  %v3467_v3 = vpop.f32.mrb[46].mxu1 }
 0x20b   :  { %v1008_v4 = vadd.f32 %v3467_v3, %v4508_v14  ;;  %v910_v9 = vpop.f32.mrb[47].mxu1  ;;  %v1039_v13 = vmax.f32 %v1007_v34, 0.0 }
 0x20c   :  { %v1006_v10 = vadd.f32 %v4508_v14, %v910_v9  ;;  %v1037_v16 = vmax.f32 %v1005_v61, 0.0 }
 0x20d   :  { %v1040_v15 = vmax.f32 %v1008_v4, 0.0 }
 0x20e   :  { %v1038_v17 = vmax.f32 %v1006_v10, 0.0 }
 0x20f   :  { %v4544_v27 = vpack.c.bf16 %v1040_v15, %v1039_v13 }
 0x210   :  { %v4546_v21 = vpack.c.bf16 %v1038_v17, %v1037_v16  ;;  %v3470_v24 = vpop.f32.mrb[48].mxu1 }
 0x211   :  { %v1011_v28 = vadd.f32 %v3470_v24, %v4508_v14  ;;  %v923_v33 = vpop.f32.mrb[49].mxu1 }
 0x212   :  { %v1009_v40 = vadd.f32 %v4508_v14, %v923_v33  ;;  %v3471_v60 = vpop.f32.mrb[50].mxu1  ;;  %3512 = vmatprep.mubr.bf16.mxu1 %v4546_v21 }
 0x213   :  { %v1012_v1 = vadd.f32 %v3471_v60, %v4508_v14  ;;  %v926_v57 = vpop.f32.mrb[51].mxu1  ;;  %3513 = vmatmul.mubr.bf16.gmra.mrb[76].mxu1 %v4544_v27  ;;  %v1043_v2 = vmax.f32 %v1011_v28, 0.0 }
 0x214   :  { %v1010_v62 = vadd.f32 %v4508_v14, %v926_v57  ;;  %v1041_v6 = vmax.f32 %v1009_v40, 0.0 }
 0x215   :  { %v1044_v46 = vmax.f32 %v1012_v1, 0.0 }
 0x216   :  { %v1042_v12 = vmax.f32 %v1010_v62, 0.0 }
 0x217   :  { %v1066_v25 = vpack.c.bf16 %v1044_v46, %v1043_v2 }
 0x218   :  { %v1065_v39 = vpack.c.bf16 %v1042_v12, %v1041_v6  ;;  %v3474_v45 = vpop.f32.mrb[52].mxu1 }
 0x219   :  { %v1015_v63 = vadd.f32 %v3474_v45, %v4508_v14  ;;  %v939_v19 = vpop.f32.mrb[53].mxu1 }
 0x21a   :  { %v1013_v34 = vadd.f32 %v4508_v14, %v939_v19  ;;  %v3475_v11 = vpop.f32.mrb[54].mxu1  ;;  %3068 = vmatprep.subr.bf16.mxu0 %v1065_v39  ;;  %3516 = vmatprep.mubr.bf16.mxu1 %v1065_v39 }
 0x21b   :  { %v1016_v61 = vadd.f32 %v3475_v11, %v4508_v14  ;;  %v942_v3 = vpop.f32.mrb[55].mxu1  ;;  %3069 = vmatpush3.bf16.msra.mxu0 %v4516_v8  ;;  %3517 = vmatmul.mubr.bf16.gmra.mrb[80].mxu1 %v1066_v25  ;;  %v1047_v9 = vmax.f32 %v1015_v63, 0.0 }
 0x21c   :  { %v1014_v4 = vadd.f32 %v4508_v14, %v942_v3  ;;  %3070 = vmatprep.subr.bf16.mxu0 %v1066_v25  ;;  %v1045_v13 = vmax.f32 %v1013_v34, 0.0 }
 0x21d   :  { %v1048_v10 = vmax.f32 %v1016_v61, 0.0 }
 0x21e   :  { %v1046_v15 = vmax.f32 %v1014_v4, 0.0 }
 0x21f   :  { %v1068_v16 = vpack.c.bf16 %v1048_v10, %v1047_v9  ;;  %3071 = vmatpush3.bf16.msra.mxu0 %v4514_v5 }
 0x220   :  { %v1067_v17 = vpack.c.bf16 %v1046_v15, %v1045_v13  ;;  %v3478_v24 = vpop.f32.mrb[56].mxu1 }
 0x221   :  { %v1019_v28 = vadd.f32 %v3478_v24, %v4508_v14  ;;  %v955_v33 = vpop.f32.mrb[57].mxu1 }
 0x222   :  { %v1017_v40 = vadd.f32 %v4508_v14, %v955_v33  ;;  %v3479_v60 = vpop.f32.mrb[58].mxu1  ;;  %3072 = vmatprep.subr.bf16.mxu0 %v1067_v17  ;;  %3520 = vmatprep.mubr.bf16.mxu1 %v1067_v17  ;;  %v3862_v17 = vld [vmem:[%s5317_s8 + $0x28] sm:$0xff]   ;;  %v3857_v33 = vld [vmem:[%s5318_s9 + $0x10] sm:$0xff]  }
 0x223   :  { %v1020_v8 = vadd.f32 %v3479_v60, %v4508_v14  ;;  %v958_v1 = vpop.f32.mrb[59].mxu1  ;;  %3073 = vmatpush3.bf16.msra.mxu0 %v4526_v59  ;;  %3521 = vmatmul.mubr.bf16.gmra.mrb[84].mxu1 %v1068_v16  ;;  %v1051_v5 = vmax.f32 %v1019_v28, 0.0 }
 0x224   :  { %v1018_v57 = vadd.f32 %v4508_v14, %v958_v1  ;;  %3074 = vmatprep.subr.bf16.mxu0 %v1068_v16  ;;  %v1049_v2 = vmax.f32 %v1017_v40, 0.0  ;;  %v3859_v1 = vld [vmem:[%s5318_s9 + $0x18] sm:$0xff]  }
 0x225   :  { %v1052_v62 = vmax.f32 %v1020_v8, 0.0 }
 0x226   :  { %v1050_v46 = vmax.f32 %v1018_v57, 0.0 }
 0x227   :  { %v1070_v6 = vpack.c.bf16 %v1052_v62, %v1051_v5  ;;  %3075 = vmatpush3.bf16.msra.mxu0 %v4524_v58 }
 0x228   :  { %v1069_v12 = vpack.c.bf16 %v1050_v46, %v1049_v2  ;;  %v3482_v25 = vpop.f32.mrb[60].mxu1  ;;  %v3861_v46 = vld [vmem:[%s5318_s9 + $0x20] sm:$0xff]  }
 0x229   :  { %v1023_v39 = vadd.f32 %v3482_v25, %v4508_v14  ;;  %v971_v45 = vpop.f32.mrb[61].mxu1 }
 0x22a   :  { %v1021_v63 = vadd.f32 %v4508_v14, %v971_v45  ;;  %v3483_v19 = vpop.f32.mrb[62].mxu1  ;;  %3076 = vmatprep.subr.bf16.mxu0 %v1069_v12  ;;  %3524 = vmatprep.mubr.bf16.mxu1 %v1069_v12 }
 0x22b   :  { %v1024_v59 = vadd.f32 %v3483_v19, %v4508_v14  ;;  %v974_v34 = vpop.f32.mrb[63].mxu1  ;;  %3077 = vmatpush3.bf16.msra.mxu0 %v4536_v0  ;;  %3525 = vmatmul.mubr.bf16.gmra.mrb[88].mxu1 %v1070_v6  ;;  %v1055_v58 = vmax.f32 %v1023_v39, 0.0  ;;  %v3844_v0 = vld [vmem:[%s5316_s5] sm:$0xff]   ;;  %v3863_v39 = vld [vmem:[%s5318_s9 + $0x28] sm:$0xff]  }
 0x22c   :  { %v1022_v11 = vadd.f32 %v4508_v14, %v974_v34  ;;  %3078 = vmatprep.subr.bf16.mxu0 %v1070_v6  ;;  %v1053_v3 = vmax.f32 %v1021_v63, 0.0  ;;  %v3845_v14 = vld [vmem:[%s5316_s5 + $0x8] sm:$0xff]   ;;  %3532 = vmatprep.subr.bf16.mxu1 %v3844_v0 }
 0x22d   :  { %v1056_v61 = vmax.f32 %v1024_v59, 0.0  ;;  %3533 = vmatpush3.bf16.msra.mxu1 %v3844_v0 }
 0x22e   :  { %v1054_v4 = vmax.f32 %v1022_v11, 0.0  ;;  %3534 = vmatprep.subr.bf16.mxu1 %v3845_v14 }
 0x22f   :  { %v1072_v9 = vpack.c.bf16 %v1056_v61, %v1055_v58  ;;  %3079 = vmatpush3.bf16.msra.mxu0 %v4534_v7  ;;  %v3846_v7 = vld [vmem:[%s5316_s5 + $0x10] sm:$0xff]  }
 0x230   :  { %v1071_v10 = vpack.c.bf16 %v1054_v4, %v1053_v3 }
 0x231   :  { %3535 = vmatpush3.bf16.msra.mxu1 %v3845_v14 }
 0x232   :  { %3080 = vmatprep.subr.bf16.mxu0 %v1071_v10  ;;  %3528 = vmatprep.mubr.bf16.mxu1 %v1071_v10 }
 0x233   :  { %3081 = vmatpush3.bf16.msra.mxu0 %v4546_v21  ;;  %3529 = vmatmul.mubr.bf16.gmra.mrb[92].mxu1 %v1072_v9  ;;  %v3847_v21 = vld [vmem:[%s5316_s5 + $0x18] sm:$0xff]  }
 0x234   :  { %3082 = vmatprep.subr.bf16.mxu0 %v1072_v9  ;;  %3536 = vmatprep.subr.bf16.mxu1 %v3846_v7 }
 0x235   :  { %3537 = vmatpush3.bf16.msra.mxu1 %v3846_v7 }
 0x236   :  { %3538 = vmatprep.subr.bf16.mxu1 %v3847_v21 }
 0x237   :  { %3083 = vmatpush3.bf16.msra.mxu0 %v4544_v27  ;;  %v3848_v27 = vld [vmem:[%s5316_s5 + $0x20] sm:$0xff]  }
 0x239   :  { %3539 = vmatpush3.bf16.msra.mxu1 %v3847_v21 }
 0x23a   :  { %1106 = vmatmul.mubr.bf16.vlgmr.msra.gmra.mrb[32].mxu0 %v4210_v18  ;;  %3540 = vmatprep.subr.bf16.mxu1 %v3848_v27  ;;  %v4607_v18 = vld [vmem:[%s5311_s0 + $0x84] ss:$8 sps:$4 sm:$0xff]  }
 0x23b   :  { %1113 = vmatprep.mubr.bf16.mxu0 %v4219_v20  ;;  %v4613_v20 = vld [vmem:[%s5311_s0 + $0x80] ss:$8 sps:$4 sm:$0xff]  }
 0x23d   :  { %3541 = vmatpush3.bf16.msra.mxu1 %v3848_v27 }
 0x242   :  { %1114 = vmatmul.mubr.bf16.gmra.mrb[36].mxu0 %v4230_v22  ;;  %v4619_v22 = vld [vmem:[%s5311_s0 + $0x94] ss:$8 sps:$4 sm:$0xff]  }
 0x243   :  { %1121 = vmatprep.mubr.bf16.mxu0 %v4235_v23  ;;  %v4625_v23 = vld [vmem:[%s5311_s0 + $0x90] ss:$8 sps:$4 sm:$0xff]  }
 0x24a   :  { %1122 = vmatmul.mubr.bf16.gmra.mrb[40].mxu0 %v4260_v29  ;;  %v3849_v29 = vld [vmem:[%s5316_s5 + $0x28] sm:$0xff]  }
 0x24b   :  { %1129 = vmatprep.mubr.bf16.mxu0 %v4265_v30  ;;  %3542 = vmatprep.subr.bf16.mxu1 %v3849_v29  ;;  %v3850_v30 = vld [vmem:[%s5316_s5 + $0x30] sm:$0xff]  }
 0x24c   :  { %3543 = vmatpush3.bf16.msra.mxu1 %v3849_v29 }
 0x24d   :  { %3544 = vmatprep.subr.bf16.mxu1 %v3850_v30 }
 0x250   :  { %3545 = vmatpush3.bf16.msra.mxu1 %v3850_v30 }
 0x252   :  { %1130 = vmatmul.mubr.bf16.gmra.mrb[44].mxu0 %v4290_v35  ;;  %v3852_v35 = vld [vmem:[%s5317_s8] sm:$0xff]  }
 0x253   :  { %1137 = vmatprep.mubr.bf16.mxu0 %v4300_v37  ;;  %3580 = vmatprep.subr.bf16.mxu0 %v3852_v35 }
 0x254   :  { %3581 = vmatpush3.bf16.msra.mxu0 %v3852_v35 }
 0x25a   :  { %1138 = vmatmul.mubr.bf16.gmra.mrb[48].mxu0 %v4320_v41 }
 0x25b   :  { %1145 = vmatprep.mubr.bf16.mxu0 %v4330_v43 }
 0x262   :  { %1146 = vmatmul.mubr.bf16.gmra.mrb[52].mxu0 %v4350_v47 }
 0x263   :  { %1153 = vmatprep.mubr.bf16.mxu0 %v4360_v49 }
 0x26a   :  { %1154 = vmatmul.mubr.bf16.gmra.mrb[56].mxu0 %v4374_v51 }
 0x26b   :  { %1161 = vmatprep.mubr.bf16.mxu0 %v4384_v53 }
 0x272   :  { %1162 = vmatmul.mubr.bf16.gmra.mrb[60].mxu0 %v4398_v55  ;;  %v3855_v55 = vld [vmem:[%s5318_s9 + $0x8] sm:$0xff]  }
 0x273   :  { %1169 = vmatprep.mubr.bf16.mxu0 %v4607_v18 }
 0x27a   :  { %1170 = vmatmul.mubr.bf16.gmra.mrb[64].mxu0 %v4613_v20 }
 0x27b   :  { %1177 = vmatprep.mubr.bf16.mxu0 %v4619_v22 }
 0x282   :  { %1178 = vmatmul.mubr.bf16.gmra.mrb[68].mxu0 %v4625_v23 }
 0x283   :  { %1185 = vmatprep.mubr.bf16.mxu0 %v4246_v26  ;;  %v3851_v26 = vld [vmem:[%s5316_s5 + $0x38] sm:$0xff]  }
 0x284   :  { %3546 = vmatprep.subr.bf16.mxu1 %v3851_v26 }
 0x285   :  { %3547 = vmatpush3.bf16.msra.mxu1 %v3851_v26 }
 0x28a   :  { %1186 = vmatmul.mubr.bf16.gmra.mrb[72].mxu0 %v4270_v31 }
 0x28b   :  { %1193 = vmatprep.mubr.bf16.mxu0 %v4275_v32 }
 0x292   :  { %1194 = vmatmul.mubr.bf16.gmra.mrb[76].mxu0 %v4295_v36 }
 0x293   :  { %1201 = vmatprep.mubr.bf16.mxu0 %v4305_v38  ;;  %v3853_v38 = vld [vmem:[%s5318_s9] sm:$0xff]  }
 0x294   :  { %3628 = vmatprep.subr.bf16.mxu1 %v3853_v38 }
 0x29a   :  { %1202 = vmatmul.mubr.bf16.gmra.mrb[80].mxu0 %v4325_v42  ;;  %v3854_v42 = vld [vmem:[%s5317_s8 + $0x8] sm:$0xff]  }
 0x29b   :  { %1209 = vmatprep.mubr.bf16.mxu0 %v4335_v44  ;;  %3582 = vmatprep.subr.bf16.mxu0 %v3854_v42  ;;  %v3856_v44 = vld [vmem:[%s5317_s8 + $0x10] sm:$0xff]  }
 0x29c   :  { %3583 = vmatpush3.bf16.msra.mxu0 %v3854_v42 }
 0x29d   :  { %3584 = vmatprep.subr.bf16.mxu0 %v3856_v44 }
 0x2a0   :  { %3585 = vmatpush3.bf16.msra.mxu0 %v3856_v44 }
 0x2a2   :  { %1210 = vmatmul.mubr.bf16.gmra.mrb[84].mxu0 %v4355_v48 }
 0x2a3   :  { %1217 = vmatprep.mubr.bf16.mxu0 %v4365_v50  ;;  %v3858_v50 = vld [vmem:[%s5317_s8 + $0x18] sm:$0xff]  }
 0x2a4   :  { %3586 = vmatprep.subr.bf16.mxu0 %v3858_v50 }
 0x2a5   :  { %3587 = vmatpush3.bf16.msra.mxu0 %v3858_v50 }
 0x2aa   :  { %1218 = vmatmul.mubr.bf16.gmra.mrb[88].mxu0 %v4379_v52 }
 0x2ab   :  { %1225 = vmatprep.mubr.bf16.mxu0 %v4389_v54 }
 0x2b2   :  { %1226 = vmatmul.mubr.bf16.gmra.mrb[92].mxu0 %v4403_v56  ;;  %v3860_v56 = vld [vmem:[%s5317_s8 + $0x20] sm:$0xff]  }
 0x2b3   :  { %3588 = vmatprep.subr.bf16.mxu0 %v3860_v56 }
 0x2b4   :  { %3589 = vmatpush3.bf16.msra.mxu0 %v3860_v56 }
 0x2b5   :  { %3590 = vmatprep.subr.bf16.mxu0 %v3862_v17 }
 0x2b8   :  { %3591 = vmatpush3.bf16.msra.mxu0 %v3862_v17 }
 0x30d   :  { %v3084_v31 = vpop.f32.mrb[32].mxu0 }
 0x30e   :  { %v3085_v32 = vpop.f32.mrb[33].mxu0 }
 0x30f   :  { %v3086_v36 = vadd.f32 %v3085_v32, %v3084_v31  ;;  %v3087_v37 = vpop.f32.mrb[34].mxu0 }
 0x310   :  { %v3088_v41 = vpop.f32.mrb[35].mxu0 }
 0x311   :  { %v3089_v43 = vadd.f32 %v3088_v41, %v3087_v37 }
 0x313   :  { %v1234_v47 = vpack.c.bf16 %v3089_v43, %v3086_v36 }
 0x315   :  { %v3090_v48 = vpop.f32.mrb[36].mxu0  ;;  %3548 = vmatprep.mubr.bf16.mxu1 %v1234_v47 }
 0x316   :  { %v3091_v49 = vpop.f32.mrb[37].mxu0 }
 0x317   :  { %v3092_v51 = vadd.f32 %v3091_v49, %v3090_v48  ;;  %v3093_v52 = vpop.f32.mrb[38].mxu0 }
 0x318   :  { %v3094_v53 = vpop.f32.mrb[39].mxu0 }
 0x319   :  { %v3095_v54 = vadd.f32 %v3094_v53, %v3093_v52 }
 0x31b   :  { %v1235_v13 = vpack.c.bf16 %v3095_v54, %v3092_v51 }
 0x31d   :  { %3549 = vmatmul.mubr.bf16.vlgmr.msra.gmra.mrb[64].mxu1 %v1235_v13  ;;  %v3096_v15 = vpop.f32.mrb[40].mxu0 }
 0x31e   :  { %v3097_v16 = vpop.f32.mrb[41].mxu0  ;;  %3629 = vmatpush3.bf16.msra.mxu1 %v3853_v38 }
 0x31f   :  { %v3098_v24 = vadd.f32 %v3097_v16, %v3096_v15  ;;  %v3099_v28 = vpop.f32.mrb[42].mxu0  ;;  %3630 = vmatprep.subr.bf16.mxu1 %v3855_v55 }
 0x320   :  { %v3100_v40 = vpop.f32.mrb[43].mxu0 }
 0x321   :  { %v3101_v60 = vadd.f32 %v3100_v40, %v3099_v28 }
 0x322   :  { %3631 = vmatpush3.bf16.msra.mxu1 %v3855_v55 }
 0x323   :  { %v1236_v8 = vpack.c.bf16 %v3101_v60, %v3098_v24  ;;  %3632 = vmatprep.subr.bf16.mxu1 %v3857_v33 }
 0x325   :  { %v3102_v57 = vpop.f32.mrb[44].mxu0  ;;  %3552 = vmatprep.mubr.bf16.mxu1 %v1236_v8 }
 0x326   :  { %v3103_v5 = vpop.f32.mrb[45].mxu0  ;;  %3633 = vmatpush3.bf16.msra.mxu1 %v3857_v33 }
 0x327   :  { %v3104_v62 = vadd.f32 %v3103_v5, %v3102_v57  ;;  %v3105_v2 = vpop.f32.mrb[46].mxu0  ;;  %3634 = vmatprep.subr.bf16.mxu1 %v3859_v1 }
 0x328   :  { %v3106_v6 = vpop.f32.mrb[47].mxu0 }
 0x329   :  { %v3107_v12 = vadd.f32 %v3106_v6, %v3105_v2 }
 0x32a   :  { %3635 = vmatpush3.bf16.msra.mxu1 %v3859_v1 }
 0x32b   :  { %v1237_v25 = vpack.c.bf16 %v3107_v12, %v3104_v62  ;;  %3636 = vmatprep.subr.bf16.mxu1 %v3861_v46 }
 0x32d   :  { %3553 = vmatmul.mubr.bf16.gmra.mrb[68].mxu1 %v1237_v25  ;;  %v3108_v45 = vpop.f32.mrb[48].mxu0 }
 0x32e   :  { %v3109_v63 = vpop.f32.mrb[49].mxu0  ;;  %3637 = vmatpush3.bf16.msra.mxu1 %v3861_v46 }
 0x32f   :  { %v3110_v19 = vadd.f32 %v3109_v63, %v3108_v45  ;;  %v3111_v59 = vpop.f32.mrb[50].mxu0  ;;  %3638 = vmatprep.subr.bf16.mxu1 %v3863_v39 }
 0x330   :  { %v3112_v34 = vpop.f32.mrb[51].mxu0 }
 0x331   :  { %v3113_v11 = vadd.f32 %v3112_v34, %v3111_v59  ;;  %v3865_v59 = vld [vmem:[%s5318_s9 + $0x30] sm:$0xff]  }
 0x332   :  { %3639 = vmatpush3.bf16.msra.mxu1 %v3863_v39 }
 0x333   :  { %v1238_v58 = vpack.c.bf16 %v3113_v11, %v3110_v19  ;;  %v3864_v19 = vld [vmem:[%s5317_s8 + $0x30] sm:$0xff]   ;;  %3640 = vmatprep.subr.bf16.mxu1 %v3865_v59 }
 0x334   :  { %3592 = vmatprep.subr.bf16.mxu0 %v3864_v19 }
 0x335   :  { %v3114_v61 = vpop.f32.mrb[52].mxu0  ;;  %3556 = vmatprep.mubr.bf16.mxu1 %v1238_v58  ;;  %3593 = vmatpush3.bf16.msra.mxu0 %v3864_v19  ;;  %v3866_v58 = vld [vmem:[%s5317_s8 + $0x38] sm:$0xff]  }
 0x336   :  { %v3115_v3 = vpop.f32.mrb[53].mxu0  ;;  %3641 = vmatpush3.bf16.msra.mxu1 %v3865_v59  ;;  %3594 = vmatprep.subr.bf16.mxu0 %v3866_v58 }
 0x337   :  { %v3116_v4 = vadd.f32 %v3115_v3, %v3114_v61  ;;  %v3117_v9 = vpop.f32.mrb[54].mxu0  ;;  %v3867_v61 = vld [vmem:[%s5318_s9 + $0x38] sm:$0xff]  }
 0x338   :  { %v3118_v10 = vpop.f32.mrb[55].mxu0  ;;  %3642 = vmatprep.subr.bf16.mxu1 %v3867_v61 }
 0x339   :  { %v3119_v0 = vadd.f32 %v3118_v10, %v3117_v9  ;;  %3595 = vmatpush3.bf16.msra.mxu0 %v3866_v58 }
 0x33a   :  { %3643 = vmatpush3.bf16.msra.mxu1 %v3867_v61 }
 0x33b   :  { %v1239_v14 = vpack.c.bf16 %v3119_v0, %v3116_v4 }
 0x33d   :  { %3557 = vmatmul.mubr.bf16.gmra.mrb[72].mxu1 %v1239_v14  ;;  %v3120_v7 = vpop.f32.mrb[56].mxu0 }
 0x33e   :  { %v3121_v21 = vpop.f32.mrb[57].mxu0 }
 0x33f   :  { %v3122_v27 = vadd.f32 %v3121_v21, %v3120_v7  ;;  %v3123_v29 = vpop.f32.mrb[58].mxu0 }
 0x340   :  { %v3124_v30 = vpop.f32.mrb[59].mxu0 }
 0x341   :  { %v3125_v26 = vadd.f32 %v3124_v30, %v3123_v29 }
 0x343   :  { %v1240_v31 = vpack.c.bf16 %v3125_v26, %v3122_v27 }
 0x345   :  { %v3126_v32 = vpop.f32.mrb[60].mxu0  ;;  %3560 = vmatprep.mubr.bf16.mxu1 %v1240_v31 }
 0x346   :  { %v3127_v35 = vpop.f32.mrb[61].mxu0 }
 0x347   :  { %v3128_v36 = vadd.f32 %v3127_v35, %v3126_v32  ;;  %v3129_v37 = vpop.f32.mrb[62].mxu0 }
 0x348   :  { %v3130_v38 = vpop.f32.mrb[63].mxu0 }
 0x349   :  { %v3131_v41 = vadd.f32 %v3130_v38, %v3129_v37 }
 0x34b   :  { %v1241_v42 = vpack.c.bf16 %v3131_v41, %v3128_v36 }
 0x34d   :  { %3561 = vmatmul.mubr.bf16.gmra.mrb[76].mxu1 %v1241_v42  ;;  %v3132_v43 = vpop.f32.mrb[64].mxu0 }
 0x34e   :  { %v3133_v44 = vpop.f32.mrb[65].mxu0 }
 0x34f   :  { %v3134_v47 = vadd.f32 %v3133_v44, %v3132_v43  ;;  %v3135_v48 = vpop.f32.mrb[66].mxu0  ;;  %v4700_v43 = vld [vmem:[%s5319_s7] ss:$0 sm:$0xff] }
 0x350   :  { %v3136_v49 = vpop.f32.mrb[67].mxu0 }
 0x351   :  { %v3137_v50 = vadd.f32 %v3136_v49, %v3135_v48 }
 0x353   :  { %v1242_v51 = vpack.c.bf16 %v3137_v50, %v3134_v47 }
 0x355   :  { %v3138_v52 = vpop.f32.mrb[68].mxu0  ;;  %3564 = vmatprep.mubr.bf16.mxu1 %v1242_v51 }
 0x356   :  { %v3139_v53 = vpop.f32.mrb[69].mxu0 }
 0x357   :  { %v3140_v54 = vadd.f32 %v3139_v53, %v3138_v52  ;;  %v3141_v55 = vpop.f32.mrb[70].mxu0 }
 0x358   :  { %v3142_v56 = vpop.f32.mrb[71].mxu0 }
 0x359   :  { %v3143_v13 = vadd.f32 %v3142_v56, %v3141_v55 }
 0x35b   :  { %v1243_v15 = vpack.c.bf16 %v3143_v13, %v3140_v54 }
 0x35d   :  { %3565 = vmatmul.mubr.bf16.gmra.mrb[80].mxu1 %v1243_v15  ;;  %v3144_v16 = vpop.f32.mrb[72].mxu0 }
 0x35e   :  { %v3145_v17 = vpop.f32.mrb[73].mxu0 }
 0x35f   :  { %v3146_v24 = vadd.f32 %v3145_v17, %v3144_v16  ;;  %v3147_v28 = vpop.f32.mrb[74].mxu0 }
 0x360   :  { %v3148_v33 = vpop.f32.mrb[75].mxu0 }
 0x361   :  { %v3149_v40 = vadd.f32 %v3148_v33, %v3147_v28 }
 0x363   :  { %v1244_v60 = vpack.c.bf16 %v3149_v40, %v3146_v24 }
 0x365   :  { %v3150_v8 = vpop.f32.mrb[76].mxu0  ;;  %3568 = vmatprep.mubr.bf16.mxu1 %v1244_v60 }
 0x366   :  { %v3151_v1 = vpop.f32.mrb[77].mxu0 }
 0x367   :  { %v3152_v57 = vadd.f32 %v3151_v1, %v3150_v8  ;;  %v3153_v5 = vpop.f32.mrb[78].mxu0 }
 0x368   :  { %v3154_v62 = vpop.f32.mrb[79].mxu0 }
 0x369   :  { %v3155_v2 = vadd.f32 %v3154_v62, %v3153_v5 }
 0x36b   :  { %v1245_v46 = vpack.c.bf16 %v3155_v2, %v3152_v57 }
 0x36d   :  { %3569 = vmatmul.mubr.bf16.gmra.mrb[84].mxu1 %v1245_v46  ;;  %v3156_v6 = vpop.f32.mrb[80].mxu0 }
 0x36e   :  { %v3157_v12 = vpop.f32.mrb[81].mxu0 }
 0x36f   :  { %v3158_v25 = vadd.f32 %v3157_v12, %v3156_v6  ;;  %v3159_v39 = vpop.f32.mrb[82].mxu0 }
 0x370   :  { %v3160_v45 = vpop.f32.mrb[83].mxu0 }
 0x371   :  { %v3161_v63 = vadd.f32 %v3160_v45, %v3159_v39 }
 0x373   :  { %v1246_v34 = vpack.c.bf16 %v3161_v63, %v3158_v25 }
 0x375   :  { %v3162_v11 = vpop.f32.mrb[84].mxu0  ;;  %3572 = vmatprep.mubr.bf16.mxu1 %v1246_v34 }
 0x376   :  { %v3163_v3 = vpop.f32.mrb[85].mxu0 }
 0x377   :  { %v3164_v4 = vadd.f32 %v3163_v3, %v3162_v11  ;;  %v3165_v9 = vpop.f32.mrb[86].mxu0 }
 0x378   :  { %v3166_v10 = vpop.f32.mrb[87].mxu0 }
 0x379   :  { %v3167_v0 = vadd.f32 %v3166_v10, %v3165_v9 }
 0x37b   :  { %v1247_v14 = vpack.c.bf16 %v3167_v0, %v3164_v4 }
 0x37d   :  { %3573 = vmatmul.mubr.bf16.gmra.mrb[88].mxu1 %v1247_v14  ;;  %v3168_v7 = vpop.f32.mrb[88].mxu0 }
 0x37e   :  { %v3169_v21 = vpop.f32.mrb[89].mxu0 }
 0x37f   :  { %v3170_v27 = vadd.f32 %v3169_v21, %v3168_v7  ;;  %v3171_v29 = vpop.f32.mrb[90].mxu0 }
 0x380   :  { %v3172_v30 = vpop.f32.mrb[91].mxu0 }
 0x381   :  { %v3173_v26 = vadd.f32 %v3172_v30, %v3171_v29 }
 0x383   :  { %v1248_v31 = vpack.c.bf16 %v3173_v26, %v3170_v27 }
 0x385   :  { %v3174_v32 = vpop.f32.mrb[92].mxu0  ;;  %3576 = vmatprep.mubr.bf16.mxu1 %v1248_v31 }
 0x386   :  { %v3175_v35 = vpop.f32.mrb[93].mxu0 }
 0x387   :  { %v3176_v36 = vadd.f32 %v3175_v35, %v3174_v32  ;;  %v3177_v37 = vpop.f32.mrb[94].mxu0 }
 0x388   :  { %v3178_v38 = vpop.f32.mrb[95].mxu0 }
 0x389   :  { %v3179_v41 = vadd.f32 %v3178_v38, %v3177_v37 }
 0x38b   :  { %v1249_v42 = vpack.c.bf16 %v3179_v41, %v3176_v36 }
 0x38d   :  { %3577 = vmatmul.mubr.bf16.gmra.mrb[92].mxu1 %v1249_v42 }
 0x3f0   :  { %v3550_v44 = vpop.f32.mrb[64].mxu1 }
 0x3f1   :  { %v1709_v47 = vadd.f32 %v3550_v44, %v4700_v43  ;;  %v1573_v48 = vpop.f32.mrb[65].mxu1 }
 0x3f2   :  { %v1707_v49 = vadd.f32 %v4700_v43, %v1573_v48  ;;  %v3551_v50 = vpop.f32.mrb[66].mxu1 }
 0x3f3   :  { %v1710_v51 = vadd.f32 %v3551_v50, %v4700_v43  ;;  %v1576_v52 = vpop.f32.mrb[67].mxu1  ;;  %v1741_v54 = vmax.f32 %v1709_v47, 0.0 }
 0x3f4   :  { %v1708_v53 = vadd.f32 %v4700_v43, %v1576_v52  ;;  %v1739_v56 = vmax.f32 %v1707_v49, 0.0 }
 0x3f5   :  { %v1742_v55 = vmax.f32 %v1710_v51, 0.0 }
 0x3f6   :  { %v1740_v13 = vmax.f32 %v1708_v53, 0.0 }
 0x3f7   :  { %v1772_v15 = vpack.c.bf16 %v1742_v55, %v1741_v54 }
 0x3f8   :  { %v1771_v16 = vpack.c.bf16 %v1740_v13, %v1739_v56 }
 0x3fa   :  { %3596 = vmatprep.mubr.bf16.mxu0 %v1771_v16  ;;  %3644 = vmatprep.mubr.bf16.mxu1 %v1771_v16 }
 0x3fb   :  { %3597 = vmatmul.mubr.bf16.vlgmr.msra.gmra.mrb[96].mxu0 %v1772_v15  ;;  %3645 = vmatmul.mubr.bf16.vlgmr.msra.gmra.mrb[96].mxu1 %v1772_v15 }
 0x400   :  { %v3554_v17 = vpop.f32.mrb[68].mxu1 }
 0x401   :  { %v1713_v24 = vadd.f32 %v3554_v17, %v4700_v43  ;;  %v1589_v28 = vpop.f32.mrb[69].mxu1 }
 0x402   :  { %v1711_v33 = vadd.f32 %v4700_v43, %v1589_v28  ;;  %v3555_v40 = vpop.f32.mrb[70].mxu1 }
 0x403   :  { %v1714_v60 = vadd.f32 %v3555_v40, %v4700_v43  ;;  %v1592_v8 = vpop.f32.mrb[71].mxu1  ;;  %v1745_v57 = vmax.f32 %v1713_v24, 0.0 }
 0x404   :  { %v1712_v1 = vadd.f32 %v4700_v43, %v1592_v8  ;;  %v1743_v62 = vmax.f32 %v1711_v33, 0.0 }
 0x405   :  { %v1746_v5 = vmax.f32 %v1714_v60, 0.0 }
 0x406   :  { %v1744_v2 = vmax.f32 %v1712_v1, 0.0 }
 0x407   :  { %v1774_v46 = vpack.c.bf16 %v1746_v5, %v1745_v57 }
 0x408   :  { %v1773_v6 = vpack.c.bf16 %v1744_v2, %v1743_v62 }
 0x40a   :  { %3600 = vmatprep.mubr.bf16.mxu0 %v1773_v6  ;;  %3648 = vmatprep.mubr.bf16.mxu1 %v1773_v6 }
 0x40b   :  { %3601 = vmatmul.mubr.bf16.gmra.mrb[100].mxu0 %v1774_v46  ;;  %3649 = vmatmul.mubr.bf16.gmra.mrb[100].mxu1 %v1774_v46 }
 0x410   :  { %v3558_v12 = vpop.f32.mrb[72].mxu1 }
 0x411   :  { %v1717_v25 = vadd.f32 %v3558_v12, %v4700_v43  ;;  %v1605_v39 = vpop.f32.mrb[73].mxu1 }
 0x412   :  { %v1715_v45 = vadd.f32 %v4700_v43, %v1605_v39  ;;  %v3559_v63 = vpop.f32.mrb[74].mxu1 }
 0x413   :  { %v1718_v19 = vadd.f32 %v3559_v63, %v4700_v43  ;;  %v1608_v59 = vpop.f32.mrb[75].mxu1  ;;  %v1749_v11 = vmax.f32 %v1717_v25, 0.0 }
 0x414   :  { %v1716_v34 = vadd.f32 %v4700_v43, %v1608_v59  ;;  %v1747_v61 = vmax.f32 %v1715_v45, 0.0 }
 0x415   :  { %v1750_v58 = vmax.f32 %v1718_v19, 0.0 }
 0x416   :  { %v1748_v3 = vmax.f32 %v1716_v34, 0.0 }
 0x417   :  { %v1776_v4 = vpack.c.bf16 %v1750_v58, %v1749_v11 }
 0x418   :  { %v1775_v9 = vpack.c.bf16 %v1748_v3, %v1747_v61 }
 0x41a   :  { %3604 = vmatprep.mubr.bf16.mxu0 %v1775_v9  ;;  %3652 = vmatprep.mubr.bf16.mxu1 %v1775_v9 }
 0x41b   :  { %3605 = vmatmul.mubr.bf16.gmra.mrb[104].mxu0 %v1776_v4  ;;  %3653 = vmatmul.mubr.bf16.gmra.mrb[104].mxu1 %v1776_v4 }
 0x420   :  { %v3562_v10 = vpop.f32.mrb[76].mxu1 }
 0x421   :  { %v1721_v0 = vadd.f32 %v3562_v10, %v4700_v43  ;;  %v1621_v14 = vpop.f32.mrb[77].mxu1 }
 0x422   :  { %v1719_v7 = vadd.f32 %v4700_v43, %v1621_v14  ;;  %v3563_v21 = vpop.f32.mrb[78].mxu1 }
 0x423   :  { %v1722_v27 = vadd.f32 %v3563_v21, %v4700_v43  ;;  %v1624_v29 = vpop.f32.mrb[79].mxu1  ;;  %v1753_v26 = vmax.f32 %v1721_v0, 0.0 }
 0x424   :  { %v1720_v30 = vadd.f32 %v4700_v43, %v1624_v29  ;;  %v1751_v32 = vmax.f32 %v1719_v7, 0.0 }
 0x425   :  { %v1754_v31 = vmax.f32 %v1722_v27, 0.0 }
 0x426   :  { %v1752_v35 = vmax.f32 %v1720_v30, 0.0 }
 0x427   :  { %v1778_v36 = vpack.c.bf16 %v1754_v31, %v1753_v26 }
 0x428   :  { %v1777_v37 = vpack.c.bf16 %v1752_v35, %v1751_v32  ;;  %v4000_v35 = vld [vmem:[%s5311_s0 + $0x4] ss:$8 sps:$4 sm:$0xff]  }
 0x42a   :  { %3608 = vmatprep.mubr.bf16.mxu0 %v1777_v37  ;;  %3656 = vmatprep.mubr.bf16.mxu1 %v1777_v37 }
 0x42b   :  { %3609 = vmatmul.mubr.bf16.gmra.mrb[108].mxu0 %v1778_v36  ;;  %3657 = vmatmul.mubr.bf16.gmra.mrb[108].mxu1 %v1778_v36 }
 0x430   :  { %v3566_v38 = vpop.f32.mrb[80].mxu1 }
 0x431   :  { %v1725_v41 = vadd.f32 %v3566_v38, %v4700_v43  ;;  %v1637_v42 = vpop.f32.mrb[81].mxu1 }
 0x432   :  { %v1723_v44 = vadd.f32 %v4700_v43, %v1637_v42  ;;  %v3567_v47 = vpop.f32.mrb[82].mxu1 }
 0x433   :  { %v1726_v48 = vadd.f32 %v3567_v47, %v4700_v43  ;;  %v1640_v49 = vpop.f32.mrb[83].mxu1  ;;  %v1757_v51 = vmax.f32 %v1725_v41, 0.0 }
 0x434   :  { %v1724_v50 = vadd.f32 %v4700_v43, %v1640_v49  ;;  %v1755_v53 = vmax.f32 %v1723_v44, 0.0 }
 0x435   :  { %v1758_v52 = vmax.f32 %v1726_v48, 0.0 }
 0x436   :  { %v1756_v54 = vmax.f32 %v1724_v50, 0.0 }
 0x437   :  { %v1780_v55 = vpack.c.bf16 %v1758_v52, %v1757_v51 }
 0x438   :  { %v1779_v56 = vpack.c.bf16 %v1756_v54, %v1755_v53 }
 0x43a   :  { %3612 = vmatprep.mubr.bf16.mxu0 %v1779_v56  ;;  %3660 = vmatprep.mubr.bf16.mxu1 %v1779_v56 }
 0x43b   :  { %3613 = vmatmul.mubr.bf16.gmra.mrb[112].mxu0 %v1780_v55  ;;  %3661 = vmatmul.mubr.bf16.gmra.mrb[112].mxu1 %v1780_v55 }
 0x440   :  { %v3570_v13 = vpop.f32.mrb[84].mxu1 }
 0x441   :  { %v1729_v15 = vadd.f32 %v3570_v13, %v4700_v43  ;;  %v1653_v16 = vpop.f32.mrb[85].mxu1 }
 0x442   :  { %v1727_v17 = vadd.f32 %v4700_v43, %v1653_v16  ;;  %v3571_v24 = vpop.f32.mrb[86].mxu1 }
 0x443   :  { %v1730_v28 = vadd.f32 %v3571_v24, %v4700_v43  ;;  %v1656_v33 = vpop.f32.mrb[87].mxu1  ;;  %v1761_v60 = vmax.f32 %v1729_v15, 0.0 }
 0x444   :  { %v1728_v40 = vadd.f32 %v4700_v43, %v1656_v33  ;;  %v1759_v1 = vmax.f32 %v1727_v17, 0.0 }
 0x445   :  { %v1762_v8 = vmax.f32 %v1730_v28, 0.0 }
 0x446   :  { %v1760_v57 = vmax.f32 %v1728_v40, 0.0 }
 0x447   :  { %v1782_v5 = vpack.c.bf16 %v1762_v8, %v1761_v60 }
 0x448   :  { %v1781_v62 = vpack.c.bf16 %v1760_v57, %v1759_v1 }
 0x44a   :  { %3616 = vmatprep.mubr.bf16.mxu0 %v1781_v62  ;;  %3664 = vmatprep.mubr.bf16.mxu1 %v1781_v62 }
 0x44b   :  { %3617 = vmatmul.mubr.bf16.gmra.mrb[116].mxu0 %v1782_v5  ;;  %3665 = vmatmul.mubr.bf16.gmra.mrb[116].mxu1 %v1782_v5 }
 0x450   :  { %v3574_v2 = vpop.f32.mrb[88].mxu1 }
 0x451   :  { %v1733_v46 = vadd.f32 %v3574_v2, %v4700_v43  ;;  %v1669_v6 = vpop.f32.mrb[89].mxu1 }
 0x452   :  { %v1731_v12 = vadd.f32 %v4700_v43, %v1669_v6  ;;  %v3575_v25 = vpop.f32.mrb[90].mxu1 }
 0x453   :  { %v1734_v39 = vadd.f32 %v3575_v25, %v4700_v43  ;;  %v1672_v45 = vpop.f32.mrb[91].mxu1  ;;  %v1765_v19 = vmax.f32 %v1733_v46, 0.0 }
 0x454   :  { %v1732_v63 = vadd.f32 %v4700_v43, %v1672_v45  ;;  %v1763_v34 = vmax.f32 %v1731_v12, 0.0 }
 0x455   :  { %v1766_v59 = vmax.f32 %v1734_v39, 0.0 }
 0x456   :  { %v1764_v11 = vmax.f32 %v1732_v63, 0.0 }
 0x457   :  { %v1784_v58 = vpack.c.bf16 %v1766_v59, %v1765_v19 }
 0x458   :  { %v1783_v61 = vpack.c.bf16 %v1764_v11, %v1763_v34 }
 0x45a   :  { %3620 = vmatprep.mubr.bf16.mxu0 %v1783_v61  ;;  %3668 = vmatprep.mubr.bf16.mxu1 %v1783_v61 }
 0x45b   :  { %3621 = vmatmul.mubr.bf16.gmra.mrb[120].mxu0 %v1784_v58  ;;  %3669 = vmatmul.mubr.bf16.gmra.mrb[120].mxu1 %v1784_v58 }
 0x460   :  { %v3578_v3 = vpop.f32.mrb[92].mxu1 }
 0x461   :  { %v1737_v4 = vadd.f32 %v3578_v3, %v4700_v43  ;;  %v1685_v9 = vpop.f32.mrb[93].mxu1 }
 0x462   :  { %v1735_v10 = vadd.f32 %v4700_v43, %v1685_v9  ;;  %v3579_v0 = vpop.f32.mrb[94].mxu1 }
 0x463   :  { %v1738_v14 = vadd.f32 %v3579_v0, %v4700_v43  ;;  %v1688_v7 = vpop.f32.mrb[95].mxu1  ;;  %v1769_v27 = vmax.f32 %v1737_v4, 0.0 }
 0x464   :  { %v1736_v21 = vadd.f32 %v4700_v43, %v1688_v7  ;;  %v1767_v30 = vmax.f32 %v1735_v10, 0.0 }
 0x465   :  { %v1770_v29 = vmax.f32 %v1738_v14, 0.0 }
 0x466   :  { %v1768_v26 = vmax.f32 %v1736_v21, 0.0 }
 0x467   :  { %v1786_v31 = vpack.c.bf16 %v1770_v29, %v1769_v27 }
 0x468   :  { %v1785_v32 = vpack.c.bf16 %v1768_v26, %v1767_v30 }
 0x46a   :  { %3624 = vmatprep.mubr.bf16.mxu0 %v1785_v32  ;;  %3672 = vmatprep.mubr.bf16.mxu1 %v1785_v32 }
 0x46b   :  { %3625 = vmatmul.mubr.bf16.gmra.mrb[124].mxu0 %v1786_v31  ;;  %3673 = vmatmul.mubr.bf16.gmra.mrb[124].mxu1 %v1786_v31 }
 0x46c   :  { %2285 = vmatprep.mubr.bf16.mxu0 %v4000_v35 }
 0x4ce   :  { %v3598_v36 = vpop.f32.mrb[96].mxu0  ;;  %v4737_v37 = vpop.f32.mrb[96].mxu1 }
 0x4cf   :  { %v1885_v38 = vpop.f32.mrb[97].mxu0  ;;  %v4739_v43 = vpop.f32.mrb[97].mxu1 }
 0x4d0   :  { %v3599_v41 = vpop.f32.mrb[98].mxu0  ;;  %v4741_v42 = vpop.f32.mrb[98].mxu1 }
 0x4d1   :  { %v2238_v44 = vpack.c.bf16 %v3599_v41, %v3598_v36  ;;  %v1888_v47 = vpop.f32.mrb[99].mxu0  ;;  %v4743_v48 = vpop.f32.mrb[99].mxu1 }
 0x4d2   :  { %v2237_v49 = vpack.c.bf16 %v1888_v47, %v1885_v38 }
 0x4de   :  { %v3602_v50 = vpop.f32.mrb[100].mxu0  ;;  %v4745_v51 = vpop.f32.mrb[100].mxu1 }
 0x4df   :  { %v1901_v52 = vpop.f32.mrb[101].mxu0  ;;  %v4747_v53 = vpop.f32.mrb[101].mxu1 }
 0x4e0   :  { %v3603_v54 = vpop.f32.mrb[102].mxu0  ;;  %v4749_v55 = vpop.f32.mrb[102].mxu1 }
 0x4e1   :  { %v2240_v56 = vpack.c.bf16 %v3603_v54, %v3602_v50  ;;  %v1904_v13 = vpop.f32.mrb[103].mxu0  ;;  %v4751_v15 = vpop.f32.mrb[103].mxu1 }
 0x4e2   :  { %v2239_v16 = vpack.c.bf16 %v1904_v13, %v1901_v52 }
 0x4ee   :  { %v3606_v17 = vpop.f32.mrb[104].mxu0  ;;  %v4753_v24 = vpop.f32.mrb[104].mxu1 }
 0x4ef   :  { %v1917_v28 = vpop.f32.mrb[105].mxu0  ;;  %v4755_v33 = vpop.f32.mrb[105].mxu1 }
 0x4f0   :  { %v3607_v40 = vpop.f32.mrb[106].mxu0  ;;  %v4757_v60 = vpop.f32.mrb[106].mxu1 }
 0x4f1   :  { %v2242_v8 = vpack.c.bf16 %v3607_v40, %v3606_v17  ;;  %v1920_v1 = vpop.f32.mrb[107].mxu0  ;;  %v4759_v57 = vpop.f32.mrb[107].mxu1 }
 0x4f2   :  { %v2241_v5 = vpack.c.bf16 %v1920_v1, %v1917_v28 }
 0x4fe   :  { %v4761_v62 = vpop.f32.mrb[108].mxu0  ;;  %v4763_v2 = vpop.f32.mrb[108].mxu1 }
 0x4ff   :  { %v1933_v46 = vpop.f32.mrb[109].mxu0  ;;  %v4765_v6 = vpop.f32.mrb[109].mxu1 }
 0x500   :  { %v3611_v12 = vpop.f32.mrb[110].mxu0  ;;  %v4767_v25 = vpop.f32.mrb[110].mxu1 }
 0x501   :  { %v2244_v39 = vpack.c.bf16 %v3611_v12, %v4761_v62  ;;  %v1936_v45 = vpop.f32.mrb[111].mxu0  ;;  %v4770_v63 = vpop.f32.mrb[111].mxu1 }
 0x502   :  { %v2243_v19 = vpack.c.bf16 %v1936_v45, %v1933_v46 }
 0x50e   :  { %v3614_v59 = vpop.f32.mrb[112].mxu0  ;;  %v4772_v34 = vpop.f32.mrb[112].mxu1 }
 0x50f   :  { %v1949_v11 = vpop.f32.mrb[113].mxu0  ;;  %v4774_v58 = vpop.f32.mrb[113].mxu1 }
 0x510   :  { %v3615_v61 = vpop.f32.mrb[114].mxu0  ;;  %v4776_v3 = vpop.f32.mrb[114].mxu1 }
 0x511   :  { %v2246_v4 = vpack.c.bf16 %v3615_v61, %v3614_v59  ;;  %v1952_v9 = vpop.f32.mrb[115].mxu0  ;;  %v4778_v10 = vpop.f32.mrb[115].mxu1  ;;  %v4003_v59 = vld [vmem:[%s5311_s0 + $0x10] ss:$8 sps:$4 sm:$0xff]  }
 0x512   :  { %v2245_v0 = vpack.c.bf16 %v1952_v9, %v1949_v11  ;;  %v4006_v11 = vld [vmem:[%s5311_s0 + $0x34] ss:$8 sps:$4 sm:$0xff]   ;;  %v4007_v61 = vld [vmem:[%s5311_s0 + $0x30] ss:$8 sps:$4 sm:$0xff]   ;;  %v4009_v9 = vld [vmem:[%s5311_s0 + $0x40] ss:$8 sps:$4 sm:$0xff]  }
 0x514   :  { %3276 = vmatprep.subr.bf16.mxu0 %v2245_v0  ;;  %v4010_v0 = vld [vmem:[%s5311_s0 + $0x54] ss:$8 sps:$4 sm:$0xff]  }
 0x515   :  { %3277 = vmatpush3.bf16.msra.mxu0 %v2237_v49 }
 0x516   :  { %3278 = vmatprep.subr.bf16.mxu0 %v2246_v4  ;;  %v4008_v4 = vld [vmem:[%s5311_s0 + $0x44] ss:$8 sps:$4 sm:$0xff]  }
 0x519   :  { %3279 = vmatpush3.bf16.msra.mxu0 %v2238_v44 }
 0x51e   :  { %v3618_v14 = vpop.f32.mrb[116].mxu0  ;;  %v4780_v7 = vpop.f32.mrb[116].mxu1 }
 0x51f   :  { %v1965_v21 = vpop.f32.mrb[117].mxu0  ;;  %v4782_v27 = vpop.f32.mrb[117].mxu1 }
 0x520   :  { %v3619_v29 = vpop.f32.mrb[118].mxu0  ;;  %v4784_v30 = vpop.f32.mrb[118].mxu1 }
 0x521   :  { %v2248_v26 = vpack.c.bf16 %v3619_v29, %v3618_v14  ;;  %v1968_v31 = vpop.f32.mrb[119].mxu0  ;;  %v4786_v32 = vpop.f32.mrb[119].mxu1  ;;  %v4011_v14 = vld [vmem:[%s5311_s0 + $0x50] ss:$8 sps:$4 sm:$0xff]   ;;  %v4013_v29 = vld [vmem:[%s5311_s0 + $0x60] ss:$8 sps:$4 sm:$0xff]  }
 0x522   :  { %v2247_v35 = vpack.c.bf16 %v1968_v31, %v1965_v21  ;;  %v4012_v21 = vld [vmem:[%s5311_s0 + $0x64] ss:$8 sps:$4 sm:$0xff]   ;;  %v4015_v31 = vld [vmem:[%s5311_s0 + $0x70] ss:$8 sps:$4 sm:$0xff]  }
 0x524   :  { %3280 = vmatprep.subr.bf16.mxu0 %v2247_v35  ;;  %v4016_v35 = vld [vmem:[%s5311_s0 + $0xa4] ss:$8 sps:$4 sm:$0xff]  }
 0x525   :  { %3281 = vmatpush3.bf16.msra.mxu0 %v2239_v16 }
 0x526   :  { %3282 = vmatprep.subr.bf16.mxu0 %v2248_v26  ;;  %v4014_v26 = vld [vmem:[%s5311_s0 + $0x74] ss:$8 sps:$4 sm:$0xff]  }
 0x529   :  { %3283 = vmatpush3.bf16.msra.mxu0 %v2240_v56 }
 0x52e   :  { %v3622_v36 = vpop.f32.mrb[120].mxu0  ;;  %v4788_v38 = vpop.f32.mrb[120].mxu1 }
 0x52f   :  { %v1981_v41 = vpop.f32.mrb[121].mxu0  ;;  %v4790_v44 = vpop.f32.mrb[121].mxu1 }
 0x530   :  { %v3623_v47 = vpop.f32.mrb[122].mxu0  ;;  %v4792_v49 = vpop.f32.mrb[122].mxu1 }
 0x531   :  { %v2250_v50 = vpack.c.bf16 %v3623_v47, %v3622_v36  ;;  %v1984_v52 = vpop.f32.mrb[123].mxu0  ;;  %v4794_v54 = vpop.f32.mrb[123].mxu1  ;;  %v4017_v36 = vld [vmem:[%s5311_s0 + $0xa0] ss:$8 sps:$4 sm:$0xff]   ;;  %v4023_v47 = vld [vmem:[%s5311_s0 + $0xd0] ss:$8 sps:$4 sm:$0xff]  }
 0x532   :  { %v2249_v13 = vpack.c.bf16 %v1984_v52, %v1981_v41  ;;  %v4022_v41 = vld [vmem:[%s5311_s0 + $0xd4] ss:$8 sps:$4 sm:$0xff]   ;;  %v4025_v52 = vld [vmem:[%s5311_s0 + $0xe0] ss:$8 sps:$4 sm:$0xff]  }
 0x534   :  { %3284 = vmatprep.subr.bf16.mxu0 %v2249_v13  ;;  %v4026_v13 = vld [vmem:[%s5311_s0 + $0xf4] ss:$8 sps:$4 sm:$0xff]  }
 0x535   :  { %3285 = vmatpush3.bf16.msra.mxu0 %v2241_v5  ;;  %v4002_v5 = vld [vmem:[%s5311_s0 + $0x14] ss:$8 sps:$4 sm:$0xff]  }
 0x536   :  { %3286 = vmatprep.subr.bf16.mxu0 %v2250_v50  ;;  %v4024_v50 = vld [vmem:[%s5311_s0 + $0xe4] ss:$8 sps:$4 sm:$0xff]  }
 0x539   :  { %3287 = vmatpush3.bf16.msra.mxu0 %v2242_v8  ;;  %v4001_v8 = vld [vmem:[%s5311_s0] ss:$8 sps:$4 sm:$0xff]  }
 0x53e   :  { %v3626_v16 = vpop.f32.mrb[124].mxu0  ;;  %v4796_v56 = vpop.f32.mrb[124].mxu1 }
 0x53f   :  { %v1997_v17 = vpop.f32.mrb[125].mxu0  ;;  %v4798_v28 = vpop.f32.mrb[125].mxu1 }
 0x540   :  { %v3627_v40 = vpop.f32.mrb[126].mxu0  ;;  %v4800_v1 = vpop.f32.mrb[126].mxu1 }
 0x541   :  { %v2252_v62 = vpack.c.bf16 %v3627_v40, %v3626_v16  ;;  %v2000_v46 = vpop.f32.mrb[127].mxu0  ;;  %v4802_v12 = vpop.f32.mrb[127].mxu1  ;;  %v4027_v16 = vld [vmem:[%s5311_s0 + $0xf0] ss:$8 sps:$4 sm:$0xff]  }
 0x542   :  { %v2251_v45 = vpack.c.bf16 %v2000_v46, %v1997_v17 }
 0x544   :  { %3288 = vmatprep.subr.bf16.mxu0 %v2251_v45 }
 0x545   :  { %3289 = vmatpush3.bf16.msra.mxu0 %v2243_v19  ;;  %v4004_v19 = vld [vmem:[%s5311_s0 + $0x24] ss:$8 sps:$4 sm:$0xff]  }
 0x546   :  { %3290 = vmatprep.subr.bf16.mxu0 %v2252_v62 }
 0x549   :  { %3291 = vmatpush3.bf16.msra.mxu0 %v2244_v39  ;;  %v4005_v39 = vld [vmem:[%s5311_s0 + $0x20] ss:$8 sps:$4 sm:$0xff]  }
 0x54c   :  { %2286 = vmatmul.mubr.bf16.vlgmr.msra.gmra.mrb[128].mxu0 %v4001_v8  ;;  %v4892_v8 = vld [vmem:[%s5320_s10] ss:$0 sm:$0xff] }
 0x54d   :  { %2293 = vmatprep.mubr.bf16.mxu0 %v4002_v5 }
 0x554   :  { %2294 = vmatmul.mubr.bf16.gmra.mrb[132].mxu0 %v4003_v59 }
 0x555   :  { %2301 = vmatprep.mubr.bf16.mxu0 %v4004_v19 }
 0x55c   :  { %2302 = vmatmul.mubr.bf16.gmra.mrb[136].mxu0 %v4005_v39 }
 0x55d   :  { %2309 = vmatprep.mubr.bf16.mxu0 %v4006_v11 }
 0x564   :  { %2310 = vmatmul.mubr.bf16.gmra.mrb[140].mxu0 %v4007_v61 }
 0x565   :  { %2317 = vmatprep.mubr.bf16.mxu0 %v4008_v4 }
 0x56c   :  { %2318 = vmatmul.mubr.bf16.gmra.mrb[144].mxu0 %v4009_v9 }
 0x56d   :  { %2325 = vmatprep.mubr.bf16.mxu0 %v4010_v0 }
 0x574   :  { %2326 = vmatmul.mubr.bf16.gmra.mrb[148].mxu0 %v4011_v14 }
 0x575   :  { %2333 = vmatprep.mubr.bf16.mxu0 %v4012_v21 }
 0x57c   :  { %2334 = vmatmul.mubr.bf16.gmra.mrb[152].mxu0 %v4013_v29 }
 0x57d   :  { %2341 = vmatprep.mubr.bf16.mxu0 %v4014_v26 }
 0x584   :  { %2342 = vmatmul.mubr.bf16.gmra.mrb[156].mxu0 %v4015_v31 }
 0x585   :  { %2349 = vmatprep.mubr.bf16.mxu0 %v4607_v18  ;;  %v4018_v18 = vld [vmem:[%s5311_s0 + $0xb4] ss:$8 sps:$4 sm:$0xff]  }
 0x58c   :  { %2350 = vmatmul.mubr.bf16.gmra.mrb[160].mxu0 %v4613_v20  ;;  %v4019_v20 = vld [vmem:[%s5311_s0 + $0xb0] ss:$8 sps:$4 sm:$0xff]  }
 0x58d   :  { %2357 = vmatprep.mubr.bf16.mxu0 %v4619_v22  ;;  %v4020_v22 = vld [vmem:[%s5311_s0 + $0xc4] ss:$8 sps:$4 sm:$0xff]  }
 0x594   :  { %2358 = vmatmul.mubr.bf16.gmra.mrb[164].mxu0 %v4625_v23  ;;  %v4021_v23 = vld [vmem:[%s5311_s0 + $0xc0] ss:$8 sps:$4 sm:$0xff]  }
 0x595   :  { %2365 = vmatprep.mubr.bf16.mxu0 %v4016_v35 }
 0x59c   :  { %2366 = vmatmul.mubr.bf16.gmra.mrb[168].mxu0 %v4017_v36 }
 0x59d   :  { %2373 = vmatprep.mubr.bf16.mxu0 %v4018_v18 }
 0x5a4   :  { %2374 = vmatmul.mubr.bf16.gmra.mrb[172].mxu0 %v4019_v20 }
 0x5a5   :  { %2381 = vmatprep.mubr.bf16.mxu0 %v4020_v22 }
 0x5ac   :  { %2382 = vmatmul.mubr.bf16.gmra.mrb[176].mxu0 %v4021_v23 }
 0x5ad   :  { %2389 = vmatprep.mubr.bf16.mxu0 %v4022_v41 }
 0x5b4   :  { %2390 = vmatmul.mubr.bf16.gmra.mrb[180].mxu0 %v4023_v47 }
 0x5b5   :  { %2397 = vmatprep.mubr.bf16.mxu0 %v4024_v50 }
 0x5bc   :  { %2398 = vmatmul.mubr.bf16.gmra.mrb[184].mxu0 %v4025_v52 }
 0x5bd   :  { %2405 = vmatprep.mubr.bf16.mxu0 %v4026_v13 }
 0x5c4   :  { %2406 = vmatmul.mubr.bf16.gmra.mrb[188].mxu0 %v4027_v16 }
 0x61f   :  { %v3292_v17 = vpop.f32.mrb[128].mxu0 }
 0x620   :  { %v3293_v40 = vpop.f32.mrb[129].mxu0 }
 0x621   :  { %v3294_v62 = vadd.f32 %v3293_v40, %v3292_v17  ;;  %v3295_v46 = vpop.f32.mrb[130].mxu0 }
 0x622   :  { %v3296_v45 = vpop.f32.mrb[131].mxu0 }
 0x623   :  { %v2288_v5 = vadd.f32 %v3294_v62, %v4739_v43  ;;  %v3297_v59 = vadd.f32 %v3296_v45, %v3295_v46 }
 0x625   :  { %v2291_v19 = vadd.f32 %v3297_v59, %v4743_v48  ;;  %v4897_v39 = vadd.f32 %v4892_v8, %v2288_v5 }
 0x627   :  { %v3298_v11 = vpop.f32.mrb[132].mxu0  ;;  %2453 = vmax.xlane.f32.xlu0 %v4897_v39  ;;  %v4901_v0 = vadd.f32 %v4892_v8, %v2291_v19 }
 0x628   :  { %v3299_v61 = vpop.f32.mrb[133].mxu0 }
 0x629   :  { %v3300_v4 = vadd.f32 %v3299_v61, %v3298_v11  ;;  %v3301_v9 = vpop.f32.mrb[134].mxu0 }
 0x62a   :  { %v3302_v14 = vpop.f32.mrb[135].mxu0 }
 0x62b   :  { %v2296_v21 = vadd.f32 %v4737_v37, %v3300_v4  ;;  %v3303_v29 = vadd.f32 %v3302_v14, %v3301_v9  ;;  %2455 = vmax.xlane.f32.xlu0 %v4901_v0 }
 0x62d   :  { %v2299_v43 = vadd.f32 %v4741_v42, %v3303_v29  ;;  %v4907_v48 = vadd.f32 %v4892_v8, %v2296_v21 }
 0x62f   :  { %v3304_v26 = vpop.f32.mrb[136].mxu0  ;;  %2457 = vmax.xlane.f32.xlu1 %v4907_v48  ;;  %v4911_v18 = vadd.f32 %v4892_v8, %v2299_v43 }
 0x630   :  { %v3305_v31 = vpop.f32.mrb[137].mxu0 }
 0x631   :  { %v3306_v35 = vadd.f32 %v3305_v31, %v3304_v26  ;;  %v3307_v36 = vpop.f32.mrb[138].mxu0 }
 0x632   :  { %v3308_v20 = vpop.f32.mrb[139].mxu0 }
 0x633   :  { %v2304_v37 = vadd.f32 %v3306_v35, %v4747_v53  ;;  %v3309_v22 = vadd.f32 %v3308_v20, %v3307_v36  ;;  %2459 = vmax.xlane.f32.xlu1 %v4911_v18 }
 0x635   :  { %v2307_v42 = vadd.f32 %v3309_v22, %v4751_v15  ;;  %v4917_v23 = vadd.f32 %v4892_v8, %v2304_v37 }
 0x637   :  { %v3310_v41 = vpop.f32.mrb[140].mxu0  ;;  %2461 = vmax.xlane.f32.xlu0 %v4917_v23  ;;  %v4921_v47 = vadd.f32 %v4892_v8, %v2307_v42 }
 0x638   :  { %v3311_v50 = vpop.f32.mrb[141].mxu0 }
 0x639   :  { %v3312_v52 = vadd.f32 %v3311_v50, %v3310_v41  ;;  %v3313_v13 = vpop.f32.mrb[142].mxu0  ;;  %2463 = vmax.xlane.f32.xlu1 %v4921_v47 }
 0x63a   :  { %v3314_v53 = vpop.f32.mrb[143].mxu0 }
 0x63b   :  { %v2312_v16 = vadd.f32 %v4745_v51, %v3312_v52  ;;  %v3315_v17 = vadd.f32 %v3314_v53, %v3313_v13 }
 0x63d   :  { %v2315_v15 = vadd.f32 %v4749_v55, %v3315_v17  ;;  %v4927_v40 = vadd.f32 %v4892_v8, %v2312_v16 }
 0x63f   :  { %v3316_v62 = vpop.f32.mrb[144].mxu0  ;;  %2465 = vmax.xlane.f32.xlu0 %v4927_v40  ;;  %v4931_v46 = vadd.f32 %v4892_v8, %v2315_v15 }
 0x640   :  { %v3317_v45 = vpop.f32.mrb[145].mxu0 }
 0x641   :  { %v3318_v5 = vadd.f32 %v3317_v45, %v3316_v62  ;;  %v3319_v59 = vpop.f32.mrb[146].mxu0  ;;  %2467 = vmax.xlane.f32.xlu1 %v4931_v46 }
 0x642   :  { %v3320_v19 = vpop.f32.mrb[147].mxu0 }
 0x643   :  { %v2320_v51 = vadd.f32 %v3318_v5, %v4755_v33  ;;  %v3321_v11 = vadd.f32 %v3320_v19, %v3319_v59 }
 0x645   :  { %v2323_v55 = vadd.f32 %v3321_v11, %v4759_v57  ;;  %v4937_v61 = vadd.f32 %v4892_v8, %v2320_v51 }
 0x647   :  { %v3322_v4 = vpop.f32.mrb[148].mxu0  ;;  %2469 = vmax.xlane.f32.xlu0 %v4937_v61  ;;  %v4941_v9 = vadd.f32 %v4892_v8, %v2323_v55 }
 0x648   :  { %v3323_v14 = vpop.f32.mrb[149].mxu0 }
 0x649   :  { %v3324_v21 = vadd.f32 %v3323_v14, %v3322_v4  ;;  %v3325_v29 = vpop.f32.mrb[150].mxu0  ;;  %2471 = vmax.xlane.f32.xlu1 %v4941_v9 }
 0x64a   :  { %v3326_v43 = vpop.f32.mrb[151].mxu0 }
 0x64b   :  { %v2328_v33 = vadd.f32 %v4753_v24, %v3324_v21  ;;  %v3327_v26 = vadd.f32 %v3326_v43, %v3325_v29 }
 0x64d   :  { %v2331_v57 = vadd.f32 %v4757_v60, %v3327_v26  ;;  %v4947_v31 = vadd.f32 %v4892_v8, %v2328_v33 }
 0x64f   :  { %v3328_v35 = vpop.f32.mrb[152].mxu0  ;;  %2473 = vmax.xlane.f32.xlu0 %v4947_v31  ;;  %v4951_v36 = vadd.f32 %v4892_v8, %v2331_v57 }
 0x650   :  { %v3329_v20 = vpop.f32.mrb[153].mxu0 }
 0x651   :  { %v3330_v37 = vadd.f32 %v3329_v20, %v3328_v35  ;;  %v3331_v22 = vpop.f32.mrb[154].mxu0  ;;  %2475 = vmax.xlane.f32.xlu1 %v4951_v36 }
 0x652   :  { %v3332_v42 = vpop.f32.mrb[155].mxu0 }
 0x653   :  { %v2336_v24 = vadd.f32 %v3330_v37, %v4765_v6  ;;  %v3333_v41 = vadd.f32 %v3332_v42, %v3331_v22 }
 0x655   :  { %v2339_v60 = vadd.f32 %v3333_v41, %v4770_v63  ;;  %v4957_v50 = vadd.f32 %v4892_v8, %v2336_v24 }
 0x657   :  { %v3334_v52 = vpop.f32.mrb[156].mxu0  ;;  %2477 = vmax.xlane.f32.xlu0 %v4957_v50  ;;  %v4961_v13 = vadd.f32 %v4892_v8, %v2339_v60 }
 0x658   :  { %v3335_v53 = vpop.f32.mrb[157].mxu0 }
 0x659   :  { %v3336_v16 = vadd.f32 %v3335_v53, %v3334_v52  ;;  %v3337_v17 = vpop.f32.mrb[158].mxu0  ;;  %2479 = vmax.xlane.f32.xlu1 %v4961_v13 }
 0x65a   :  { %v3338_v15 = vpop.f32.mrb[159].mxu0 }
 0x65b   :  { %v2344_v6 = vadd.f32 %v4763_v2, %v3336_v16  ;;  %v3339_v62 = vadd.f32 %v3338_v15, %v3337_v17 }
 0x65d   :  { %v2347_v63 = vadd.f32 %v4767_v25, %v3339_v62  ;;  %v4967_v45 = vadd.f32 %v4892_v8, %v2344_v6 }
 0x65f   :  { %v3340_v5 = vpop.f32.mrb[160].mxu0  ;;  %2481 = vmax.xlane.f32.xlu0 %v4967_v45  ;;  %v4971_v59 = vadd.f32 %v4892_v8, %v2347_v63 }
 0x660   :  { %v3341_v19 = vpop.f32.mrb[161].mxu0 }
 0x661   :  { %v3342_v51 = vadd.f32 %v3341_v19, %v3340_v5  ;;  %v3343_v11 = vpop.f32.mrb[162].mxu0  ;;  %2483 = vmax.xlane.f32.xlu1 %v4971_v59 }
 0x662   :  { %v3344_v55 = vpop.f32.mrb[163].mxu0 }
 0x663   :  { %v2352_v2 = vadd.f32 %v3342_v51, %v4774_v58  ;;  %v3345_v4 = vadd.f32 %v3344_v55, %v3343_v11 }
 0x665   :  { %v2355_v25 = vadd.f32 %v3345_v4, %v4778_v10  ;;  %v4977_v14 = vadd.f32 %v4892_v8, %v2352_v2 }
 0x667   :  { %v3346_v21 = vpop.f32.mrb[164].mxu0  ;;  %2485 = vmax.xlane.f32.xlu0 %v4977_v14  ;;  %v4981_v29 = vadd.f32 %v4892_v8, %v2355_v25 }
 0x668   :  { %v3347_v43 = vpop.f32.mrb[165].mxu0 }
 0x669   :  { %v3348_v33 = vadd.f32 %v3347_v43, %v3346_v21  ;;  %v3349_v26 = vpop.f32.mrb[166].mxu0  ;;  %2487 = vmax.xlane.f32.xlu1 %v4981_v29 }
 0x66a   :  { %v3350_v57 = vpop.f32.mrb[167].mxu0 }
 0x66b   :  { %v2360_v58 = vadd.f32 %v4772_v34, %v3348_v33  ;;  %v3351_v35 = vadd.f32 %v3350_v57, %v3349_v26 }
 0x66d   :  { %v2363_v10 = vadd.f32 %v4776_v3, %v3351_v35  ;;  %v4987_v20 = vadd.f32 %v4892_v8, %v2360_v58 }
 0x66f   :  { %v3352_v37 = vpop.f32.mrb[168].mxu0  ;;  %2489 = vmax.xlane.f32.xlu0 %v4987_v20  ;;  %v4991_v22 = vadd.f32 %v4892_v8, %v2363_v10 }
 0x670   :  { %v3353_v42 = vpop.f32.mrb[169].mxu0 }
 0x671   :  { %v3354_v24 = vadd.f32 %v3353_v42, %v3352_v37  ;;  %v3355_v41 = vpop.f32.mrb[170].mxu0  ;;  %2491 = vmax.xlane.f32.xlu1 %v4991_v22 }
 0x672   :  { %v3356_v60 = vpop.f32.mrb[171].mxu0 }
 0x673   :  { %v2368_v34 = vadd.f32 %v3354_v24, %v4782_v27  ;;  %v3357_v52 = vadd.f32 %v3356_v60, %v3355_v41 }
 0x675   :  { %v2371_v3 = vadd.f32 %v3357_v52, %v4786_v32  ;;  %v4997_v53 = vadd.f32 %v4892_v8, %v2368_v34 }
 0x677   :  { %v3358_v16 = vpop.f32.mrb[172].mxu0  ;;  %2493 = vmax.xlane.f32.xlu0 %v4997_v53  ;;  %v5001_v17 = vadd.f32 %v4892_v8, %v2371_v3 }
 0x678   :  { %v3359_v15 = vpop.f32.mrb[173].mxu0 }
 0x679   :  { %v3360_v6 = vadd.f32 %v3359_v15, %v3358_v16  ;;  %v3361_v62 = vpop.f32.mrb[174].mxu0  ;;  %2495 = vmax.xlane.f32.xlu1 %v5001_v17 }
 0x67a   :  { %v3362_v63 = vpop.f32.mrb[175].mxu0 }
 0x67b   :  { %v2376_v27 = vadd.f32 %v4780_v7, %v3360_v6  ;;  %v3363_v5 = vadd.f32 %v3362_v63, %v3361_v62 }
 0x67d   :  { %v2379_v32 = vadd.f32 %v4784_v30, %v3363_v5  ;;  %v5007_v19 = vadd.f32 %v4892_v8, %v2376_v27 }
 0x67f   :  { %v3364_v51 = vpop.f32.mrb[176].mxu0  ;;  %2497 = vmax.xlane.f32.xlu0 %v5007_v19  ;;  %v5011_v11 = vadd.f32 %v4892_v8, %v2379_v32 }
 0x680   :  { %v3365_v55 = vpop.f32.mrb[177].mxu0 }
 0x681   :  { %v3366_v2 = vadd.f32 %v3365_v55, %v3364_v51  ;;  %v3367_v4 = vpop.f32.mrb[178].mxu0  ;;  %2499 = vmax.xlane.f32.xlu1 %v5011_v11 }
 0x682   :  { %v3368_v25 = vpop.f32.mrb[179].mxu0 }
 0x683   :  { %v2384_v7 = vadd.f32 %v3366_v2, %v4790_v44  ;;  %v3369_v21 = vadd.f32 %v3368_v25, %v3367_v4 }
 0x685   :  { %v2387_v30 = vadd.f32 %v3369_v21, %v4794_v54  ;;  %v5017_v43 = vadd.f32 %v4892_v8, %v2384_v7 }
 0x687   :  { %v3370_v33 = vpop.f32.mrb[180].mxu0  ;;  %2501 = vmax.xlane.f32.xlu0 %v5017_v43  ;;  %v5021_v26 = vadd.f32 %v4892_v8, %v2387_v30 }
 0x688   :  { %v3371_v57 = vpop.f32.mrb[181].mxu0 }
 0x689   :  { %v3372_v58 = vadd.f32 %v3371_v57, %v3370_v33  ;;  %v3373_v35 = vpop.f32.mrb[182].mxu0  ;;  %2503 = vmax.xlane.f32.xlu1 %v5021_v26 }
 0x68a   :  { %v3374_v10 = vpop.f32.mrb[183].mxu0 }
 0x68b   :  { %v2392_v44 = vadd.f32 %v4788_v38, %v3372_v58  ;;  %v3375_v37 = vadd.f32 %v3374_v10, %v3373_v35 }
 0x68d   :  { %v2395_v54 = vadd.f32 %v4792_v49, %v3375_v37  ;;  %v5027_v42 = vadd.f32 %v4892_v8, %v2392_v44 }
 0x68f   :  { %v3376_v24 = vpop.f32.mrb[184].mxu0  ;;  %2505 = vmax.xlane.f32.xlu0 %v5027_v42  ;;  %v5031_v41 = vadd.f32 %v4892_v8, %v2395_v54 }
 0x690   :  { %v3377_v60 = vpop.f32.mrb[185].mxu0 }
 0x691   :  { %v3378_v34 = vadd.f32 %v3377_v60, %v3376_v24  ;;  %v3379_v52 = vpop.f32.mrb[186].mxu0  ;;  %2507 = vmax.xlane.f32.xlu1 %v5031_v41 }
 0x692   :  { %v3380_v3 = vpop.f32.mrb[187].mxu0 }
 0x693   :  { %v2400_v38 = vadd.f32 %v3378_v34, %v4798_v28  ;;  %v3381_v16 = vadd.f32 %v3380_v3, %v3379_v52 }
 0x695   :  { %v2403_v49 = vadd.f32 %v3381_v16, %v4802_v12  ;;  %v5037_v15 = vadd.f32 %v4892_v8, %v2400_v38 }
 0x697   :  { %v3382_v6 = vpop.f32.mrb[188].mxu0  ;;  %2509 = vmax.xlane.f32.xlu0 %v5037_v15  ;;  %v5041_v62 = vadd.f32 %v4892_v8, %v2403_v49 }
 0x698   :  { %v3383_v63 = vpop.f32.mrb[189].mxu0 }
 0x699   :  { %v3384_v27 = vadd.f32 %v3383_v63, %v3382_v6  ;;  %v3385_v5 = vpop.f32.mrb[190].mxu0  ;;  %2511 = vmax.xlane.f32.xlu1 %v5041_v62 }
 0x69a   :  { %v3386_v32 = vpop.f32.mrb[191].mxu0 }
 0x69b   :  { %v2408_v28 = vadd.f32 %v4796_v56, %v3384_v27  ;;  %v3387_v51 = vadd.f32 %v3386_v32, %v3385_v5 }
 0x69d   :  { %v2411_v12 = vadd.f32 %v4800_v1, %v3387_v51  ;;  %v5047_v55 = vadd.f32 %v4892_v8, %v2408_v28 }
 0x69f   :  { %2513 = vmax.xlane.f32.xlu0 %v5047_v55  ;;  %v5051_v2 = vadd.f32 %v4892_v8, %v2411_v12 }
 0x6a1   :  { %2515 = vmax.xlane.f32.xlu1 %v5051_v2 }
 0x6b4   :  { %v2454_v4 = vpop.xlane.xlu0 %2453 }
 0x6b5   :  { %v5055_v25 = vsub.f32 %v4897_v39, %v2454_v4 }
 0x6b7   :  { %v2549_v7 = vmul.f32 1.442695, %v5055_v25 }
 0x6b8   :  { %v2456_v56 = vpop.xlane.xlu0 %2455 }
 0x6b9   :  { %3868 = vpow2.f32 %v2549_v7  ;;  %v5059_v1 = vsub.f32 %v4901_v0, %v2456_v56 }
 0x6bb   :  { %v2551_v21 = vmul.f32 1.442695, %v5059_v1 }
 0x6bc   :  { %v2458_v30 = vpop.xlane.xlu1 %2457 }
 0x6bd   :  { %3870 = vpow2.f32 %v2551_v21  ;;  %v5063_v8 = vsub.f32 %v4907_v48, %v2458_v30 }
 0x6bf   :  { %v2553_v33 = vmul.f32 1.442695, %v5063_v8 }
 0x6c0   :  { %v2460_v57 = vpop.xlane.xlu1 %2459 }
 0x6c1   :  { %3872 = vpow2.f32 %v2553_v33  ;;  %v5067_v39 = vsub.f32 %v4911_v18, %v2460_v57 }
 0x6c3   :  { %v3869_v58 = vpop.eup %3868  ;;  %v2555_v35 = vmul.f32 1.442695, %v5067_v39 }
 0x6c4   :  { %2613 = vadd.xlane.f32.xlu0 %v3869_v58  ;;  %v2462_v0 = vpop.xlane.xlu0 %2461 }
 0x6c5   :  { %3874 = vpow2.f32 %v2555_v35  ;;  %v5071_v10 = vsub.f32 %v4917_v23, %v2462_v0 }
 0x6c6   :  { %v2464_v44 = vpop.xlane.xlu1 %2463 }
 0x6c7   :  { %v3871_v37 = vpop.eup %3870  ;;  %v2557_v48 = vmul.f32 1.442695, %v5071_v10  ;;  %v5075_v54 = vsub.f32 %v4921_v47, %v2464_v44 }
 0x6c8   :  { %2615 = vadd.xlane.f32.xlu1 %v3871_v37 }
 0x6c9   :  { %3876 = vpow2.f32 %v2557_v48  ;;  %v2559_v18 = vmul.f32 1.442695, %v5075_v54 }
 0x6cb   :  { %v3873_v24 = vpop.eup %3872  ;;  %3878 = vpow2.f32 %v2559_v18 }
 0x6cc   :  { %2617 = vadd.xlane.f32.xlu0 %v3873_v24  ;;  %v2466_v60 = vpop.xlane.xlu0 %2465 }
 0x6cd   :  { %v5079_v34 = vsub.f32 %v4927_v40, %v2466_v60 }
 0x6ce   :  { %v2468_v23 = vpop.xlane.xlu1 %2467 }
 0x6cf   :  { %v3875_v52 = vpop.eup %3874  ;;  %v2561_v3 = vmul.f32 1.442695, %v5079_v34  ;;  %v5083_v38 = vsub.f32 %v4931_v46, %v2468_v23 }
 0x6d0   :  { %2619 = vadd.xlane.f32.xlu1 %v3875_v52 }
 0x6d1   :  { %3880 = vpow2.f32 %v2561_v3  ;;  %v2563_v47 = vmul.f32 1.442695, %v5083_v38 }
 0x6d3   :  { %v3877_v16 = vpop.eup %3876  ;;  %3882 = vpow2.f32 %v2563_v47 }
 0x6d4   :  { %2621 = vadd.xlane.f32.xlu0 %v3877_v16  ;;  %v2470_v49 = vpop.xlane.xlu0 %2469 }
 0x6d5   :  { %v3879_v6 = vpop.eup %3878  ;;  %v5087_v63 = vsub.f32 %v4937_v61, %v2470_v49 }
 0x6d6   :  { %v2472_v40 = vpop.xlane.xlu1 %2471  ;;  %2623 = vadd.xlane.f32.xlu1 %v3879_v6 }
 0x6d7   :  { %v2565_v27 = vmul.f32 1.442695, %v5087_v63  ;;  %v5091_v5 = vsub.f32 %v4941_v9, %v2472_v40 }
 0x6d9   :  { %3884 = vpow2.f32 %v2565_v27  ;;  %v2567_v46 = vmul.f32 1.442695, %v5091_v5 }
 0x6db   :  { %v3881_v32 = vpop.eup %3880  ;;  %3886 = vpow2.f32 %v2567_v46 }
 0x6dc   :  { %2625 = vadd.xlane.f32.xlu0 %v3881_v32  ;;  %v2474_v28 = vpop.xlane.xlu0 %2473 }
 0x6dd   :  { %v3883_v51 = vpop.eup %3882  ;;  %v5095_v12 = vsub.f32 %v4947_v31, %v2474_v28 }
 0x6de   :  { %v2476_v61 = vpop.xlane.xlu1 %2475  ;;  %2627 = vadd.xlane.f32.xlu1 %v3883_v51 }
 0x6df   :  { %v2569_v4 = vmul.f32 1.442695, %v5095_v12  ;;  %v5099_v7 = vsub.f32 %v4951_v36, %v2476_v61 }
 0x6e1   :  { %3888 = vpow2.f32 %v2569_v4  ;;  %v2571_v9 = vmul.f32 1.442695, %v5099_v7 }
 0x6e3   :  { %v3885_v56 = vpop.eup %3884  ;;  %3890 = vpow2.f32 %v2571_v9 }
 0x6e4   :  { %2629 = vadd.xlane.f32.xlu0 %v3885_v56  ;;  %v2478_v21 = vpop.xlane.xlu0 %2477 }
 0x6e5   :  { %v3887_v30 = vpop.eup %3886  ;;  %v5103_v33 = vsub.f32 %v4957_v50, %v2478_v21 }
 0x6e6   :  { %v2480_v31 = vpop.xlane.xlu1 %2479  ;;  %2631 = vadd.xlane.f32.xlu1 %v3887_v30 }
 0x6e7   :  { %v2573_v57 = vmul.f32 1.442695, %v5103_v33  ;;  %v5107_v58 = vsub.f32 %v4961_v13, %v2480_v31 }
 0x6e9   :  { %3892 = vpow2.f32 %v2573_v57  ;;  %v2575_v36 = vmul.f32 1.442695, %v5107_v58 }
 0x6eb   :  { %v3889_v35 = vpop.eup %3888  ;;  %3894 = vpow2.f32 %v2575_v36 }
 0x6ec   :  { %2633 = vadd.xlane.f32.xlu0 %v3889_v35  ;;  %v2482_v0 = vpop.xlane.xlu0 %2481 }
 0x6ed   :  { %v3891_v44 = vpop.eup %3890  ;;  %v5111_v37 = vsub.f32 %v4967_v45, %v2482_v0 }
 0x6ee   :  { %v2484_v50 = vpop.xlane.xlu1 %2483  ;;  %2635 = vadd.xlane.f32.xlu1 %v3891_v44 }
 0x6ef   :  { %v2577_v48 = vmul.f32 1.442695, %v5111_v37  ;;  %v5115_v18 = vsub.f32 %v4971_v59, %v2484_v50 }
 0x6f1   :  { %3896 = vpow2.f32 %v2577_v48  ;;  %v2579_v13 = vmul.f32 1.442695, %v5115_v18 }
 0x6f3   :  { %v3893_v24 = vpop.eup %3892  ;;  %3898 = vpow2.f32 %v2579_v13 }
 0x6f4   :  { %2637 = vadd.xlane.f32.xlu0 %v3893_v24  ;;  %v2486_v60 = vpop.xlane.xlu0 %2485 }
 0x6f5   :  { %v3895_v23 = vpop.eup %3894  ;;  %v5119_v52 = vsub.f32 %v4977_v14, %v2486_v60 }
 0x6f6   :  { %v2488_v45 = vpop.xlane.xlu1 %2487  ;;  %2639 = vadd.xlane.f32.xlu1 %v3895_v23 }
 0x6f7   :  { %v2581_v3 = vmul.f32 1.442695, %v5119_v52  ;;  %v5123_v47 = vsub.f32 %v4981_v29, %v2488_v45 }
 0x6f9   :  { %3900 = vpow2.f32 %v2581_v3  ;;  %v2583_v59 = vmul.f32 1.442695, %v5123_v47 }
 0x6fb   :  { %v3897_v16 = vpop.eup %3896  ;;  %3902 = vpow2.f32 %v2583_v59 }
 0x6fc   :  { %2641 = vadd.xlane.f32.xlu0 %v3897_v16  ;;  %v2490_v49 = vpop.xlane.xlu0 %2489 }
 0x6fd   :  { %v3899_v6 = vpop.eup %3898  ;;  %v5127_v40 = vsub.f32 %v4987_v20, %v2490_v49 }
 0x6fe   :  { %v2492_v14 = vpop.xlane.xlu1 %2491  ;;  %2643 = vadd.xlane.f32.xlu1 %v3899_v6 }
 0x6ff   :  { %v2585_v27 = vmul.f32 1.442695, %v5127_v40  ;;  %v5131_v46 = vsub.f32 %v4991_v22, %v2492_v14 }
 0x701   :  { %3904 = vpow2.f32 %v2585_v27  ;;  %v2587_v29 = vmul.f32 1.442695, %v5131_v46 }
 0x703   :  { %v3901_v32 = vpop.eup %3900  ;;  %3906 = vpow2.f32 %v2587_v29 }
 0x704   :  { %2645 = vadd.xlane.f32.xlu0 %v3901_v32  ;;  %v2494_v28 = vpop.xlane.xlu0 %2493 }
 0x705   :  { %v3903_v51 = vpop.eup %3902  ;;  %v5135_v61 = vsub.f32 %v4997_v53, %v2494_v28 }
 0x706   :  { %v2496_v20 = vpop.xlane.xlu1 %2495  ;;  %2647 = vadd.xlane.f32.xlu1 %v3903_v51 }
 0x707   :  { %v2589_v4 = vmul.f32 1.442695, %v5135_v61  ;;  %v5139_v9 = vsub.f32 %v5001_v17, %v2496_v20 }
 0x709   :  { %3908 = vpow2.f32 %v2589_v4  ;;  %v2591_v22 = vmul.f32 1.442695, %v5139_v9 }
 0x70b   :  { %v3905_v56 = vpop.eup %3904  ;;  %3910 = vpow2.f32 %v2591_v22 }
 0x70c   :  { %2649 = vadd.xlane.f32.xlu0 %v3905_v56  ;;  %v2498_v21 = vpop.xlane.xlu0 %2497 }
 0x70d   :  { %v3907_v30 = vpop.eup %3906  ;;  %v5143_v31 = vsub.f32 %v5007_v19, %v2498_v21 }
 0x70e   :  { %v2500_v53 = vpop.xlane.xlu1 %2499  ;;  %2651 = vadd.xlane.f32.xlu1 %v3907_v30 }
 0x70f   :  { %v2593_v57 = vmul.f32 1.442695, %v5143_v31  ;;  %v5147_v36 = vsub.f32 %v5011_v11, %v2500_v53 }
 0x711   :  { %3912 = vpow2.f32 %v2593_v57  ;;  %v2595_v17 = vmul.f32 1.442695, %v5147_v36 }
 0x713   :  { %v3909_v35 = vpop.eup %3908  ;;  %3914 = vpow2.f32 %v2595_v17 }
 0x714   :  { %2653 = vadd.xlane.f32.xlu0 %v3909_v35  ;;  %v2502_v0 = vpop.xlane.xlu0 %2501 }
 0x715   :  { %v3911_v44 = vpop.eup %3910  ;;  %v5151_v50 = vsub.f32 %v5017_v43, %v2502_v0 }
 0x716   :  { %v2504_v19 = vpop.xlane.xlu1 %2503  ;;  %2655 = vadd.xlane.f32.xlu1 %v3911_v44 }
 0x717   :  { %v2597_v48 = vmul.f32 1.442695, %v5151_v50  ;;  %v5155_v13 = vsub.f32 %v5021_v26, %v2504_v19 }
 0x719   :  { %3916 = vpow2.f32 %v2597_v48  ;;  %v2599_v11 = vmul.f32 1.442695, %v5155_v13 }
 0x71b   :  { %v3913_v24 = vpop.eup %3912  ;;  %3918 = vpow2.f32 %v2599_v11 }
 0x71c   :  { %2657 = vadd.xlane.f32.xlu0 %v3913_v24  ;;  %v2506_v60 = vpop.xlane.xlu0 %2505 }
 0x71d   :  { %v3915_v23 = vpop.eup %3914  ;;  %v5159_v45 = vsub.f32 %v5027_v42, %v2506_v60 }
 0x71e   :  { %v2508_v43 = vpop.xlane.xlu1 %2507  ;;  %2659 = vadd.xlane.f32.xlu1 %v3915_v23 }
 0x71f   :  { %v2601_v3 = vmul.f32 1.442695, %v5159_v45  ;;  %v5163_v59 = vsub.f32 %v5031_v41, %v2508_v43 }
 0x721   :  { %3920 = vpow2.f32 %v2601_v3  ;;  %v2603_v26 = vmul.f32 1.442695, %v5163_v59 }
 0x723   :  { %v3917_v16 = vpop.eup %3916  ;;  %3922 = vpow2.f32 %v2603_v26 }
 0x724   :  { %2661 = vadd.xlane.f32.xlu0 %v3917_v16  ;;  %v2510_v49 = vpop.xlane.xlu0 %2509 }
 0x725   :  { %v3919_v6 = vpop.eup %3918  ;;  %v5167_v14 = vsub.f32 %v5037_v15, %v2510_v49 }
 0x726   :  { %v2512_v42 = vpop.xlane.xlu1 %2511  ;;  %2663 = vadd.xlane.f32.xlu1 %v3919_v6 }
 0x727   :  { %v2605_v27 = vmul.f32 1.442695, %v5167_v14  ;;  %v5171_v29 = vsub.f32 %v5041_v62, %v2512_v42 }
 0x729   :  { %3924 = vpow2.f32 %v2605_v27  ;;  %v2607_v41 = vmul.f32 1.442695, %v5171_v29 }
 0x72b   :  { %v3921_v32 = vpop.eup %3920  ;;  %3926 = vpow2.f32 %v2607_v41 }
 0x72c   :  { %2665 = vadd.xlane.f32.xlu0 %v3921_v32  ;;  %v2514_v28 = vpop.xlane.xlu0 %2513 }
 0x72d   :  { %v3923_v51 = vpop.eup %3922  ;;  %v5175_v20 = vsub.f32 %v5047_v55, %v2514_v28 }
 0x72e   :  { %v2516_v15 = vpop.xlane.xlu1 %2515  ;;  %2667 = vadd.xlane.f32.xlu1 %v3923_v51 }
 0x72f   :  { %v2609_v4 = vmul.f32 1.442695, %v5175_v20  ;;  %v5179_v22 = vsub.f32 %v5051_v2, %v2516_v15 }
 0x731   :  { %3928 = vpow2.f32 %v2609_v4  ;;  %v2611_v62 = vmul.f32 1.442695, %v5179_v22 }
 0x733   :  { %v3925_v56 = vpop.eup %3924  ;;  %3930 = vpow2.f32 %v2611_v62 }
 0x734   :  { %2669 = vadd.xlane.f32.xlu0 %v3925_v56 }
 0x735   :  { %v3927_v21 = vpop.eup %3926 }
 0x736   :  { %2671 = vadd.xlane.f32.xlu1 %v3927_v21 }
 0x73b   :  { %v3929_v30 = vpop.eup %3928 }
 0x73c   :  { %2673 = vadd.xlane.f32.xlu0 %v3929_v30 }
 0x73d   :  { %v3931_v53 = vpop.eup %3930 }
 0x73e   :  { %2675 = vadd.xlane.f32.xlu1 %v3931_v53 }
 0x751   :  { %v2614_v55 = vpop.xlane.xlu0 %2613 }
 0x752   :  { %3932 = vlog2.f32 %v2614_v55 }
 0x755   :  { %v2616_v57 = vpop.xlane.xlu1 %2615 }
 0x756   :  { %3934 = vlog2.f32 %v2616_v57 }
 0x759   :  { %v2618_v17 = vpop.xlane.xlu0 %2617 }
 0x75a   :  { %3936 = vlog2.f32 %v2618_v17 }
 0x75c   :  { %v3933_v2 = vpop.eup %3932 }
 0x75d   :  { %v2678_v35 = vmul.f32 0.6931472, %v3933_v2  ;;  %v2620_v0 = vpop.xlane.xlu1 %2619 }
 0x75e   :  { %3938 = vlog2.f32 %v2620_v0 }
 0x75f   :  { %v2741_v44 = vsub.f32 %v5055_v25, %v2678_v35 }
 0x760   :  { %v3935_v19 = vpop.eup %3934 }
 0x761   :  { %2773 = vst [vmem:[%s5321_s11] sm:$0xff] %v2741_v44  ;;  %v2680_v48 = vmul.f32 0.6931472, %v3935_v19  ;;  %v2622_v11 = vpop.xlane.xlu0 %2621 }
 0x762   :  { %3940 = vlog2.f32 %v2622_v11 }
 0x763   :  { %v2742_v24 = vsub.f32 %v5059_v1, %v2680_v48  ;;  %v2624_v60 = vpop.xlane.xlu1 %2623 }
 0x764   :  { %v3937_v23 = vpop.eup %3936  ;;  %3942 = vlog2.f32 %v2624_v60 }
 0x765   :  { %2774 = vst [vmem:[%s5321_s11 + $0x8] sm:$0xff] %v2742_v24  ;;  %v2682_v43 = vmul.f32 0.6931472, %v3937_v23 }
 0x767   :  { %v2743_v25 = vsub.f32 %v5063_v8, %v2682_v43 }
 0x768   :  { %v3939_v3 = vpop.eup %3938 }
 0x769   :  { %2775 = vst [vmem:[%s5321_s11 + $0x10] sm:$0xff] %v2743_v25  ;;  %v2684_v26 = vmul.f32 0.6931472, %v3939_v3  ;;  %v2626_v16 = vpop.xlane.xlu0 %2625 }
 0x76a   :  { %3944 = vlog2.f32 %v2626_v16 }
 0x76b   :  { %v2744_v1 = vsub.f32 %v5067_v39, %v2684_v26  ;;  %v2628_v49 = vpop.xlane.xlu1 %2627 }
 0x76c   :  { %v3941_v6 = vpop.eup %3940  ;;  %3946 = vlog2.f32 %v2628_v49 }
 0x76d   :  { %2776 = vst [vmem:[%s5321_s11 + $0x18] sm:$0xff] %v2744_v1  ;;  %v2686_v42 = vmul.f32 0.6931472, %v3941_v6 }
 0x76e   :  { %v3943_v27 = vpop.eup %3942 }
 0x76f   :  { %v2745_v8 = vsub.f32 %v5071_v10, %v2686_v42  ;;  %v2688_v41 = vmul.f32 0.6931472, %v3943_v27 }
 0x771   :  { %2777 = vst [vmem:[%s5321_s11 + $0x20] sm:$0xff] %v2745_v8  ;;  %v2746_v32 = vsub.f32 %v5075_v54, %v2688_v41  ;;  %v2630_v28 = vpop.xlane.xlu0 %2629 }
 0x772   :  { %3948 = vlog2.f32 %v2630_v28 }
 0x773   :  { %2778 = vst [vmem:[%s5321_s11 + $0x28] sm:$0xff] %v2746_v32  ;;  %v2632_v39 = vpop.xlane.xlu1 %2631 }
 0x774   :  { %v3945_v51 = vpop.eup %3944  ;;  %3950 = vlog2.f32 %v2632_v39 }
 0x775   :  { %v2690_v15 = vmul.f32 0.6931472, %v3945_v51 }
 0x776   :  { %v3947_v4 = vpop.eup %3946 }
 0x777   :  { %v2747_v10 = vsub.f32 %v5079_v34, %v2690_v15  ;;  %v2692_v62 = vmul.f32 0.6931472, %v3947_v4 }
 0x779   :  { %2779 = vst [vmem:[%s5321_s11 + $0x30] sm:$0xff] %v2747_v10  ;;  %v2748_v54 = vsub.f32 %v5083_v38, %v2692_v62  ;;  %v2634_v56 = vpop.xlane.xlu0 %2633 }
 0x77a   :  { %3952 = vlog2.f32 %v2634_v56 }
 0x77b   :  { %2780 = vst [vmem:[%s5321_s11 + $0x38] sm:$0xff] %v2748_v54  ;;  %v2636_v21 = vpop.xlane.xlu1 %2635 }
 0x77c   :  { %v3949_v30 = vpop.eup %3948  ;;  %3954 = vlog2.f32 %v2636_v21 }
 0x77d   :  { %v2694_v53 = vmul.f32 0.6931472, %v3949_v30 }
 0x77e   :  { %v3951_v55 = vpop.eup %3950 }
 0x77f   :  { %v2749_v34 = vsub.f32 %v5087_v63, %v2694_v53  ;;  %v2696_v57 = vmul.f32 0.6931472, %v3951_v55 }
 0x781   :  { %2781 = vst [vmem:[%s5321_s11 + $0x40] sm:$0xff] %v2749_v34  ;;  %v2750_v38 = vsub.f32 %v5091_v5, %v2696_v57  ;;  %v2638_v17 = vpop.xlane.xlu0 %2637 }
 0x782   :  { %3956 = vlog2.f32 %v2638_v17 }
 0x783   :  { %2782 = vst [vmem:[%s5321_s11 + $0x48] sm:$0xff] %v2750_v38  ;;  %v2640_v2 = vpop.xlane.xlu1 %2639 }
 0x784   :  { %v3953_v35 = vpop.eup %3952  ;;  %3958 = vlog2.f32 %v2640_v2 }
 0x785   :  { %v2698_v0 = vmul.f32 0.6931472, %v3953_v35 }
 0x786   :  { %v3955_v44 = vpop.eup %3954 }
 0x787   :  { %v2751_v63 = vsub.f32 %v5095_v12, %v2698_v0  ;;  %v2700_v19 = vmul.f32 0.6931472, %v3955_v44 }
 0x789   :  { %2783 = vst [vmem:[%s5321_s11 + $0x50] sm:$0xff] %v2751_v63  ;;  %v2752_v5 = vsub.f32 %v5099_v7, %v2700_v19  ;;  %v2642_v48 = vpop.xlane.xlu0 %2641 }
 0x78a   :  { %3960 = vlog2.f32 %v2642_v48 }
 0x78b   :  { %2784 = vst [vmem:[%s5321_s11 + $0x58] sm:$0xff] %v2752_v5  ;;  %v2644_v11 = vpop.xlane.xlu1 %2643 }
 0x78c   :  { %v3957_v24 = vpop.eup %3956  ;;  %3962 = vlog2.f32 %v2644_v11 }
 0x78d   :  { %v2702_v60 = vmul.f32 0.6931472, %v3957_v24 }
 0x78e   :  { %v3959_v23 = vpop.eup %3958 }
 0x78f   :  { %v2753_v12 = vsub.f32 %v5103_v33, %v2702_v60  ;;  %v2704_v43 = vmul.f32 0.6931472, %v3959_v23 }
 0x791   :  { %2785 = vst [vmem:[%s5321_s11 + $0x60] sm:$0xff] %v2753_v12  ;;  %v2754_v7 = vsub.f32 %v5107_v58, %v2704_v43  ;;  %v2646_v25 = vpop.xlane.xlu0 %2645 }
 0x792   :  { %3964 = vlog2.f32 %v2646_v25 }
 0x793   :  { %2786 = vst [vmem:[%s5321_s11 + $0x68] sm:$0xff] %v2754_v7  ;;  %v2648_v3 = vpop.xlane.xlu1 %2647 }
 0x794   :  { %v3961_v26 = vpop.eup %3960  ;;  %3966 = vlog2.f32 %v2648_v3 }
 0x795   :  { %v2706_v16 = vmul.f32 0.6931472, %v3961_v26 }
 0x796   :  { %v3963_v1 = vpop.eup %3962 }
 0x797   :  { %v2755_v33 = vsub.f32 %v5111_v37, %v2706_v16  ;;  %v2708_v49 = vmul.f32 0.6931472, %v3963_v1 }
 0x799   :  { %2787 = vst [vmem:[%s5321_s11 + $0x70] sm:$0xff] %v2755_v33  ;;  %v2756_v58 = vsub.f32 %v5115_v18, %v2708_v49  ;;  %v2650_v6 = vpop.xlane.xlu0 %2649 }
 0x79a   :  { %3968 = vlog2.f32 %v2650_v6 }
 0x79b   :  { %2788 = vst [vmem:[%s5321_s11 + $0x78] sm:$0xff] %v2756_v58  ;;  %v2652_v42 = vpop.xlane.xlu1 %2651 }
 0x79c   :  { %v3965_v27 = vpop.eup %3964  ;;  %3970 = vlog2.f32 %v2652_v42 }
 0x79d   :  { %v2710_v8 = vmul.f32 0.6931472, %v3965_v27 }
 0x79e   :  { %v3967_v41 = vpop.eup %3966 }
 0x79f   :  { %v2757_v37 = vsub.f32 %v5119_v52, %v2710_v8  ;;  %v2712_v32 = vmul.f32 0.6931472, %v3967_v41 }
 0x7a1   :  { %2789 = vst [vmem:[%s5321_s11 + $0x80] sm:$0xff] %v2757_v37  ;;  %v2758_v18 = vsub.f32 %v5123_v47, %v2712_v32  ;;  %v2654_v28 = vpop.xlane.xlu0 %2653 }
 0x7a2   :  { %3972 = vlog2.f32 %v2654_v28 }
 0x7a3   :  { %2790 = vst [vmem:[%s5321_s11 + $0x88] sm:$0xff] %v2758_v18  ;;  %v2656_v39 = vpop.xlane.xlu1 %2655 }
 0x7a4   :  { %v3969_v51 = vpop.eup %3968  ;;  %3974 = vlog2.f32 %v2656_v39 }
 0x7a5   :  { %v2714_v15 = vmul.f32 0.6931472, %v3969_v51 }
 0x7a6   :  { %v3971_v4 = vpop.eup %3970 }
 0x7a7   :  { %v2759_v52 = vsub.f32 %v5127_v40, %v2714_v15  ;;  %v2716_v10 = vmul.f32 0.6931472, %v3971_v4 }
 0x7a9   :  { %2791 = vst [vmem:[%s5321_s11 + $0x90] sm:$0xff] %v2759_v52  ;;  %v2760_v47 = vsub.f32 %v5131_v46, %v2716_v10  ;;  %v2658_v62 = vpop.xlane.xlu0 %2657 }
 0x7aa   :  { %3976 = vlog2.f32 %v2658_v62 }
 0x7ab   :  { %2792 = vst [vmem:[%s5321_s11 + $0x98] sm:$0xff] %v2760_v47  ;;  %v2660_v54 = vpop.xlane.xlu1 %2659 }
 0x7ac   :  { %v3973_v56 = vpop.eup %3972  ;;  %3978 = vlog2.f32 %v2660_v54 }
 0x7ad   :  { %v2718_v21 = vmul.f32 0.6931472, %v3973_v56 }
 0x7ae   :  { %v3975_v30 = vpop.eup %3974 }
 0x7af   :  { %v2761_v40 = vsub.f32 %v5135_v61, %v2718_v21  ;;  %v2720_v53 = vmul.f32 0.6931472, %v3975_v30 }
 0x7b1   :  { %2793 = vst [vmem:[%s5321_s11 + $0xa0] sm:$0xff] %v2761_v40  ;;  %v2762_v46 = vsub.f32 %v5139_v9, %v2720_v53  ;;  %v2662_v55 = vpop.xlane.xlu0 %2661 }
 0x7b2   :  { %3980 = vlog2.f32 %v2662_v55 }
 0x7b3   :  { %2794 = vst [vmem:[%s5321_s11 + $0xa8] sm:$0xff] %v2762_v46  ;;  %v2664_v34 = vpop.xlane.xlu1 %2663 }
 0x7b4   :  { %v3977_v57 = vpop.eup %3976  ;;  %3982 = vlog2.f32 %v2664_v34 }
 0x7b5   :  { %v2722_v38 = vmul.f32 0.6931472, %v3977_v57 }
 0x7b6   :  { %v3979_v17 = vpop.eup %3978 }
 0x7b7   :  { %v2763_v61 = vsub.f32 %v5143_v31, %v2722_v38  ;;  %v2724_v2 = vmul.f32 0.6931472, %v3979_v17 }
 0x7b9   :  { %2795 = vst [vmem:[%s5321_s11 + $0xb0] sm:$0xff] %v2763_v61  ;;  %v2764_v9 = vsub.f32 %v5147_v36, %v2724_v2  ;;  %v2666_v35 = vpop.xlane.xlu0 %2665 }
 0x7ba   :  { %3984 = vlog2.f32 %v2666_v35 }
 0x7bb   :  { %2796 = vst [vmem:[%s5321_s11 + $0xb8] sm:$0xff] %v2764_v9  ;;  %v2668_v0 = vpop.xlane.xlu1 %2667 }
 0x7bc   :  { %v3981_v44 = vpop.eup %3980  ;;  %3986 = vlog2.f32 %v2668_v0 }
 0x7bd   :  { %v2726_v63 = vmul.f32 0.6931472, %v3981_v44 }
 0x7be   :  { %v3983_v19 = vpop.eup %3982 }
 0x7bf   :  { %v2765_v31 = vsub.f32 %v5151_v50, %v2726_v63  ;;  %v2728_v5 = vmul.f32 0.6931472, %v3983_v19 }
 0x7c1   :  { %2797 = vst [vmem:[%s5321_s11 + $0xc0] sm:$0xff] %v2765_v31  ;;  %v2766_v36 = vsub.f32 %v5155_v13, %v2728_v5  ;;  %v2670_v48 = vpop.xlane.xlu0 %2669 }
 0x7c2   :  { %3988 = vlog2.f32 %v2670_v48 }
 0x7c3   :  { %2798 = vst [vmem:[%s5321_s11 + $0xc8] sm:$0xff] %v2766_v36  ;;  %v2672_v11 = vpop.xlane.xlu1 %2671 }
 0x7c4   :  { %v3985_v24 = vpop.eup %3984  ;;  %3990 = vlog2.f32 %v2672_v11 }
 0x7c5   :  { %v2730_v60 = vmul.f32 0.6931472, %v3985_v24 }
 0x7c6   :  { %v3987_v23 = vpop.eup %3986 }
 0x7c7   :  { %v2767_v50 = vsub.f32 %v5159_v45, %v2730_v60  ;;  %v2732_v12 = vmul.f32 0.6931472, %v3987_v23 }
 0x7c9   :  { %2799 = vst [vmem:[%s5321_s11 + $0xd0] sm:$0xff] %v2767_v50  ;;  %v2768_v13 = vsub.f32 %v5163_v59, %v2732_v12  ;;  %v2674_v43 = vpop.xlane.xlu0 %2673 }
 0x7ca   :  { %3992 = vlog2.f32 %v2674_v43 }
 0x7cb   :  { %2800 = vst [vmem:[%s5321_s11 + $0xd8] sm:$0xff] %v2768_v13  ;;  %v2676_v7 = vpop.xlane.xlu1 %2675 }
 0x7cc   :  { %v3989_v25 = vpop.eup %3988  ;;  %3994 = vlog2.f32 %v2676_v7 }
 0x7cd   :  { %v2734_v3 = vmul.f32 0.6931472, %v3989_v25 }
 0x7ce   :  { %v3991_v26 = vpop.eup %3990 }
 0x7cf   :  { %v2769_v45 = vsub.f32 %v5167_v14, %v2734_v3  ;;  %v2736_v16 = vmul.f32 0.6931472, %v3991_v26 }
 0x7d1   :  { %2801 = vst [vmem:[%s5321_s11 + $0xe0] sm:$0xff] %v2769_v45  ;;  %v2770_v59 = vsub.f32 %v5171_v29, %v2736_v16 }
 0x7d3   :  { %2802 = vst [vmem:[%s5321_s11 + $0xe8] sm:$0xff] %v2770_v59 }
 0x7d4   :  { %v3993_v1 = vpop.eup %3992 }
 0x7d5   :  { %v2738_v33 = vmul.f32 0.6931472, %v3993_v1 }
 0x7d6   :  { %v3995_v49 = vpop.eup %3994 }
 0x7d7   :  { %v2771_v58 = vsub.f32 %v5175_v20, %v2738_v33  ;;  %v2740_v6 = vmul.f32 0.6931472, %v3995_v49 }
 0x7d9   :  { %2803 = vst [vmem:[%s5321_s11 + $0xf0] sm:$0xff] %v2771_v58  ;;  %v2772_v14 = vsub.f32 %v5179_v22, %v2740_v6 }
 0x7db   :  { %2804 = vst [vmem:[%s5321_s11 + $0xf8] sm:$0xff] %v2772_v14 }

</bundles_post_ra>
